<compile_context>
chip_gen: v7x
topology: tpu7x:2x2x1
jax: 0.10.0
libtpu: 0.0.40
codegen_flags: <defaults>
</compile_context>

<pallas_src>
import jax
import jax.numpy as jnp
from jax import lax
from jax.experimental import pallas as pl
from jax.experimental.pallas import tpu as pltpu

_MXU_DTYPE = jnp.bfloat16
_VMEM_LIMIT = 32 * 1024 * 1024


# ---------------------------------------------------------------------------
# wrapper-side prep helpers (plain JAX, traced once under jit)
# ---------------------------------------------------------------------------
def _tile_h(H):
    return 8 if H % 8 == 0 else H


def _rowify(v, W):
    """(n, C) -> (n, 1, W*C), channel-fastest, matching the (H, W*C) layout."""
    return jnp.tile(v, (1, W))[:, None, :]


def _make_bands(wconv, W, Cin, Cout, ksize):
    """Block-Toeplitz bands: band[dy] maps a (W*Cin) row to the (W*Cout) output
    row contribution of kernel row dy.  W-boundary zero padding is baked in."""
    wt = wconv.reshape(ksize, ksize, Cin, Cout).astype(jnp.float32)
    pad = ksize // 2
    bands = []
    for dy in range(ksize):
        b = jnp.zeros((W * Cin, W * Cout), jnp.float32)
        for dx in range(ksize):
            b = b + jnp.kron(jnp.eye(W, k=pad - dx, dtype=jnp.float32), wt[dy, dx])
        bands.append(b)
    return jnp.stack(bands).astype(_MXU_DTYPE)      # (ksize, W*Cin, W*Cout)


def _compiler_params():
    return pltpu.CompilerParams(
        dimension_semantics=("parallel", "parallel"),
        vmem_limit_bytes=_VMEM_LIMIT)


# ---------------------------------------------------------------------------
# in-kernel building blocks
# ---------------------------------------------------------------------------
def _shift_mats(h, dtype):
    """0/1 matrices: (s_dn @ z)[r] = z[r-1] (row 0 -> 0); (s_up @ z)[r] = z[r+1]."""
    rows = lax.broadcasted_iota(jnp.int32, (h, h), 0)
    cols = lax.broadcasted_iota(jnp.int32, (h, h), 1)
    s_dn = (rows == cols + 1).astype(dtype)
    s_up = (rows == cols - 1).astype(dtype)
    return s_dn, s_up


def _band_conv3(z, band_ref, s_dn, s_up, acc_ref):
    """acc_ref <- full-height 3x3 conv of bf16 z via 3 row-banded MXU matmuls."""
    z_dn = jnp.dot(s_dn, z, preferred_element_type=jnp.float32).astype(z.dtype)
    z_up = jnp.dot(s_up, z, preferred_element_type=jnp.float32).astype(z.dtype)
    acc_ref[...] = jnp.dot(z_dn, band_ref[0], preferred_element_type=jnp.float32)
    acc_ref[...] += jnp.dot(z, band_ref[1], preferred_element_type=jnp.float32)
    acc_ref[...] += jnp.dot(z_up, band_ref[2], preferred_element_type=jnp.float32)


# ---------------------------------------------------------------------------
# kernel A: conv_0 (+ y residual)  and  1x1 proj, sharing one read of x
# ---------------------------------------------------------------------------
def _kernel_a(H, TH):
    def kernel(x_ref, y_ref, s0_ref, b0_ref, band0_ref, cb0_ref,
               sp_ref, bp_ref, bandp_ref, cbp_ref, xb_ref, pr_ref, acc_ref):
        r0 = pl.multiple_of(pl.program_id(1) * TH, TH)
        x = x_ref[0]                                           # (H, W*Cin) f32
        s_dn, s_up = _shift_mats(H, _MXU_DTYPE)

        # conv_0: BN -> ReLU -> 3x3 conv (+bias), then + y residual
        z0 = jnp.maximum(x * s0_ref[0] + b0_ref[0], 0.0).astype(_MXU_DTYPE)
        _band_conv3(z0, band0_ref, s_dn, s_up, acc_ref)
        xb_ref[0] = (acc_ref[pl.ds(r0, TH), :] + cb0_ref[0] + y_ref[0]
                     ).astype(xb_ref.dtype)

        # proj: BN -> 1x1 conv (+bias), no ReLU
        zp = (x * sp_ref[0] + bp_ref[0]).astype(_MXU_DTYPE)
        acc_ref[...] = jnp.dot(zp, bandp_ref[0], preferred_element_type=jnp.float32)
        pr_ref[0] = (acc_ref[pl.ds(r0, TH), :] + cbp_ref[0]).astype(pr_ref.dtype)
    return kernel


def _conv0_proj_call(x_flat, y_flat, bn0, w0, b0, bnp, wp, bp, *, H, W, Cin, Cout):
    N = x_flat.shape[0]
    TH = _tile_h(H)
    R = H // TH
    WCi, WCo = W * Cin, W * Cout

    s0r = _rowify(bn0[0][None, :], W)
    b0r = _rowify(bn0[1][None, :], W)
    spr = _rowify(bnp[0][None, :], W)
    bpr = _rowify(bnp[1][None, :], W)
    band0 = _make_bands(w0, W, Cin, Cout, 3)
    bandp = _make_bands(wp, W, Cin, Cout, 1)
    cb0r = _rowify(b0[None, :], W)
    cbpr = _rowify(bp[None, :], W)

    img_in = pl.BlockSpec((1, H, WCi), lambda n, r: (n, 0, 0))
    tile_o = pl.BlockSpec((1, TH, WCo), lambda n, r: (n, r, 0))
    row_i = pl.BlockSpec((1, 1, WCi), lambda n, r: (0, 0, 0))
    row_o = pl.BlockSpec((1, 1, WCo), lambda n, r: (0, 0, 0))
    band3_s = pl.BlockSpec((3, WCi, WCo), lambda n, r: (0, 0, 0))
    band1_s = pl.BlockSpec((1, WCi, WCo), lambda n, r: (0, 0, 0))

    flops = N * R * (4 * 2 * H * WCi * WCo + 2 * 2 * H * H * WCi)
    bytes_accessed = 4 * (x_flat.size + y_flat.size + 2 * N * H * WCo)

    return pl.pallas_call(
        _kernel_a(H, TH),
        out_shape=(jax.ShapeDtypeStruct((N, H, WCo), jnp.float32),
                   jax.ShapeDtypeStruct((N, H, WCo), jnp.float32)),
        grid_spec=pltpu.PrefetchScalarGridSpec(
            num_scalar_prefetch=0,
            grid=(N, R),
            in_specs=[img_in, tile_o,
                      row_i, row_i, band3_s, row_o,
                      row_i, row_i, band1_s, row_o],
            out_specs=(tile_o, tile_o),
            scratch_shapes=[pltpu.VMEM((H, WCo), jnp.float32)]),
        compiler_params=_compiler_params(),
        cost_estimate=pl.CostEstimate(flops=int(flops), transcendentals=0,
                                      bytes_accessed=int(bytes_accessed)),
    )(x_flat, y_flat, s0r, b0r, band0, cb0r, spr, bpr, bandp, cbpr)


# ---------------------------------------------------------------------------
# kernel B: conv_1 on xb (style folded into bias) + proj residual
# ---------------------------------------------------------------------------
def _kernel_b(H, TH):
    def kernel(xb_ref, pr_ref, s1_ref, b1_ref, band1_ref, cb1_ref,
               out_ref, acc_ref):
        r0 = pl.multiple_of(pl.program_id(1) * TH, TH)
        x = xb_ref[0]                                          # (H, W*C) f32
        s_dn, s_up = _shift_mats(H, _MXU_DTYPE)
        z = jnp.maximum(x * s1_ref[0] + b1_ref[0], 0.0).astype(_MXU_DTYPE)
        _band_conv3(z, band1_ref, s_dn, s_up, acc_ref)
        out_ref[0] = (acc_ref[pl.ds(r0, TH), :] + cb1_ref[0] + pr_ref[0]
                      ).astype(out_ref.dtype)
    return kernel


def _conv1_call(xb_flat, pr_flat, bn1, feat1, w1, b1, *, H, W, C):
    N = xb_flat.shape[0]
    TH = _tile_h(H)
    R = H // TH
    WC = W * C

    s1r = _rowify(bn1[0][None, :], W)
    b1r = _rowify(bn1[1][None, :] + feat1 * bn1[0][None, :], W)   # style folded
    band1 = _make_bands(w1, W, C, C, 3)
    cb1r = _rowify(b1[None, :], W)

    img_in = pl.BlockSpec((1, H, WC), lambda n, r: (n, 0, 0))
    tile_io = pl.BlockSpec((1, TH, WC), lambda n, r: (n, r, 0))
    row_c = pl.BlockSpec((1, 1, WC), lambda n, r: (0, 0, 0))
    row_n = pl.BlockSpec((1, 1, WC), lambda n, r: (n, 0, 0))
    band_s = pl.BlockSpec((3, WC, WC), lambda n, r: (0, 0, 0))

    flops = N * R * (3 * 2 * H * WC * WC + 2 * 2 * H * H * WC)
    bytes_accessed = 4 * (xb_flat.size + pr_flat.size + N * H * WC)

    return pl.pallas_call(
        _kernel_b(H, TH),
        out_shape=jax.ShapeDtypeStruct((N, H, WC), jnp.float32),
        grid_spec=pltpu.PrefetchScalarGridSpec(
            num_scalar_prefetch=0,
            grid=(N, R),
            in_specs=[img_in, tile_io, row_c, row_n, band_s, row_c],
            out_specs=tile_io,
            scratch_shapes=[pltpu.VMEM((H, WC), jnp.float32)]),
        compiler_params=_compiler_params(),
        cost_estimate=pl.CostEstimate(flops=int(flops), transcendentals=0,
                                      bytes_accessed=int(bytes_accessed)),
    )(xb_flat, pr_flat, s1r, b1r, band1, cb1r)


# ---------------------------------------------------------------------------
# kernel C: conv_2 -> conv_3 fused (c2 stays in VMEM) + x1 residual
# ---------------------------------------------------------------------------
def _kernel_c(H, TH):
    def kernel(x1_ref, s2_ref, b2_ref, band2_ref, cb2_ref,
               s3_ref, b3_ref, band3_ref, cb3_ref, out_ref, acc_ref):
        r0 = pl.multiple_of(pl.program_id(1) * TH, TH)
        x1 = x1_ref[0]                                         # (H, W*C) f32
        s_dn, s_up = _shift_mats(H, _MXU_DTYPE)

        # conv_2
        z2 = jnp.maximum(x1 * s2_ref[0] + b2_ref[0], 0.0).astype(_MXU_DTYPE)
        _band_conv3(z2, band2_ref, s_dn, s_up, acc_ref)
        c2 = acc_ref[...] + cb2_ref[0]                         # never leaves VMEM

        # conv_3, then + x1 residual
        z3 = jnp.maximum(c2 * s3_ref[0] + b3_ref[0], 0.0).astype(_MXU_DTYPE)
        _band_conv3(z3, band3_ref, s_dn, s_up, acc_ref)
        out_ref[0] = (acc_ref[pl.ds(r0, TH), :] + cb3_ref[0]
                      + x1_ref[0, pl.ds(r0, TH), :]).astype(out_ref.dtype)
    return kernel


def _conv23_call(x1_flat, bn2, feat2, w2, b2, bn3, feat3, w3, b3, *, H, W, C):
    N = x1_flat.shape[0]
    TH = _tile_h(H)
    R = H // TH
    WC = W * C

    s2r = _rowify(bn2[0][None, :], W)
    b2r = _rowify(bn2[1][None, :] + feat2 * bn2[0][None, :], W)
    s3r = _rowify(bn3[0][None, :], W)
    b3r = _rowify(bn3[1][None, :] + feat3 * bn3[0][None, :], W)
    band2 = _make_bands(w2, W, C, C, 3)
    band3 = _make_bands(w3, W, C, C, 3)
    cb2r = _rowify(b2[None, :], W)
    cb3r = _rowify(b3[None, :], W)

    img_in = pl.BlockSpec((1, H, WC), lambda n, r: (n, 0, 0))
    tile_o = pl.BlockSpec((1, TH, WC), lambda n, r: (n, r, 0))
    row_c = pl.BlockSpec((1, 1, WC), lambda n, r: (0, 0, 0))
    row_n = pl.BlockSpec((1, 1, WC), lambda n, r: (n, 0, 0))
    band_s = pl.BlockSpec((3, WC, WC), lambda n, r: (0, 0, 0))

    flops = N * R * (6 * 2 * H * WC * WC + 4 * 2 * H * H * WC)
    bytes_accessed = 4 * (2 * x1_flat.size)

    return pl.pallas_call(
        _kernel_c(H, TH),
        out_shape=jax.ShapeDtypeStruct((N, H, WC), jnp.float32),
        grid_spec=pltpu.PrefetchScalarGridSpec(
            num_scalar_prefetch=0,
            grid=(N, R),
            in_specs=[img_in, row_c, row_n, band_s, row_c,
                      row_c, row_n, band_s, row_c],
            out_specs=tile_o,
            scratch_shapes=[pltpu.VMEM((H, WC), jnp.float32)]),
        compiler_params=_compiler_params(),
        cost_estimate=pl.CostEstimate(flops=int(flops), transcendentals=0,
                                      bytes_accessed=int(bytes_accessed)),
    )(x1_flat, s2r, b2r, band2, cb2r, s3r, b3r, band3, cb3r)


# ---------------------------------------------------------------------------
# resup.forward:
#   xb = conv_0(x) + y
#   x1 = proj(x) + conv_1(style, xb)
#   out = x1 + conv_3(style, conv_2(style, x1))
# ---------------------------------------------------------------------------
def resup_forward(params, x, y, style):
    p = params
    N, H, W, Cin = x.shape
    Cout = p['conv0'][1].shape[0]
    xf = x.reshape(N, H, W * Cin)        # pure reshapes -> lane-dense (W*C) layout
    yf = y.reshape(N, H, W * Cout)

    # per-sample style features (tiny matmuls), folded into the BN bias rows
    feat1 = style @ p['wl1'] + p['bl1']
    feat2 = style @ p['wl2'] + p['bl2']
    feat3 = style @ p['wl3'] + p['bl3']

    xb, pr = _conv0_proj_call(xf, yf, p['bn0'], *p['conv0'], p['bnp'], *p['convp'],
                              H=H, W=W, Cin=Cin, Cout=Cout)
    x1 = _conv1_call(xb, pr, p['bn1'], feat1, *p['conv1'], H=H, W=W, C=Cout)
    out = _conv23_call(x1, p['bn2'], feat2, *p['conv2'],
                       p['bn3'], feat3, *p['conv3'], H=H, W=W, C=Cout)
    return out.reshape(N, H, W, Cout)


# ---------------------------------------------------------------------------
# Pure-JAX f32 reference (for correctness checking)
# ---------------------------------------------------------------------------
def _ref_block(x, scale, bias, wconv, bconv, *, ksize, use_relu,
               style=None, wl=None, bl=None, residual=None):
    z = x
    if style is not None:
        feat = style @ wl + bl
        z = z + feat[:, None, None, :]
    z = z * scale + bias
    if use_relu:
        z = jnp.maximum(z, 0.0)
    w = wconv.reshape(ksize, ksize, wconv.shape[1], wconv.shape[2])
    out = lax.conv_general_dilated(
        z, w, window_strides=(1, 1), padding='SAME',
        dimension_numbers=('NHWC', 'HWIO', 'NHWC')) + bconv
    if residual is not None:
        out = out + residual
    return out


def resup_reference(params, x, y, style):
    p = params
    xb = _ref_block(x, *p['bn0'], *p['conv0'], ksize=3, use_relu=True, residual=y)
    pr = _ref_block(x, *p['bnp'], *p['convp'], ksize=1, use_relu=False)
    x1 = _ref_block(xb, *p['bn1'], *p['conv1'], ksize=3, use_relu=True,
                    style=style, wl=p['wl1'], bl=p['bl1'], residual=pr)
    c2 = _ref_block(x1, *p['bn2'], *p['conv2'], ksize=3, use_relu=True,
                    style=style, wl=p['wl2'], bl=p['bl2'])
    return _ref_block(c2, *p['bn3'], *p['conv3'], ksize=3, use_relu=True,
                      style=style, wl=p['wl3'], bl=p['bl3'], residual=x1)


# ---------------------------------------------------------------------------
# Deterministic parameter init (BatchNorm eval stats folded to scale/bias)
# ---------------------------------------------------------------------------
def init_bn(key, C):
    k1, k2, k3, k4 = jax.random.split(key, 4)
    gamma = 1.0 + 0.1 * jax.random.normal(k1, (C,), jnp.float32)
    beta = 0.1 * jax.random.normal(k2, (C,), jnp.float32)
    mean = 0.1 * jax.random.normal(k3, (C,), jnp.float32)
    var = 1.0 + 0.1 * jax.random.uniform(k4, (C,), jnp.float32)
    scale = gamma / jnp.sqrt(var + 1e-5)
    bias = beta - mean * scale
    return scale, bias


def init_conv(key, Cin, Cout, k):
    k1, k2 = jax.random.split(key)
    w = 0.3 * jax.random.normal(k1, (k, k, Cin, Cout), jnp.float32) / jnp.sqrt(k * k * Cin)
    b = 0.05 * jax.random.normal(k2, (Cout,), jnp.float32)
    return w.reshape(k * k, Cin, Cout), b


def init_linear(key, S, C):
    k1, k2 = jax.random.split(key)
    wl = 0.3 * jax.random.normal(k1, (S, C), jnp.float32) / jnp.sqrt(S)
    bl = 0.05 * jax.random.normal(k2, (C,), jnp.float32)
    return wl, bl


if __name__ == "__main__":
    N, H, W = 2, 16, 16
    Cin, Cout, S = 4, 8, 6   # in_channels, out_channels, style_channels

    key = jax.random.PRNGKey(0)
    keys = jax.random.split(key, 20)

    x = jax.random.normal(keys[0], (N, H, W, Cin), jnp.float32)
    y = jax.random.normal(keys[1], (N, H, W, Cout), jnp.float32)
    style = jax.random.normal(keys[2], (N, S), jnp.float32)

    params = {
        'bn0': init_bn(keys[3], Cin),  'conv0': init_conv(keys[4], Cin, Cout, 3),
        'bnp': init_bn(keys[5], Cin),  'convp': init_conv(keys[6], Cin, Cout, 1),
        'bn1': init_bn(keys[7], Cout), 'conv1': init_conv(keys[8], Cout, Cout, 3),
        'bn2': init_bn(keys[9], Cout), 'conv2': init_conv(keys[10], Cout, Cout, 3),
        'bn3': init_bn(keys[11], Cout), 'conv3': init_conv(keys[12], Cout, Cout, 3),
    }
    params['wl1'], params['bl1'] = init_linear(keys[13], S, Cout)
    params['wl2'], params['bl2'] = init_linear(keys[14], S, Cout)
    params['wl3'], params['bl3'] = init_linear(keys[15], S, Cout)

    fwd = jax.jit(resup_forward)
    ref_fn = jax.jit(resup_reference)

    out = jax.block_until_ready(fwd(params, x, y, style))
    assert out.shape == (N, H, W, Cout)

    ref = jax.block_until_ready(ref_fn(params, x, y, style))
    assert bool(jnp.all(jnp.isfinite(out)))
    # Tolerance accounts for bf16 MXU operands (f32 accumulation) across the
    # 4-deep conv chain; genuine bugs produce errors >= ~0.1.
    err = float(jnp.max(jnp.abs(out - ref)))
    assert bool(jnp.allclose(out, ref, atol=3e-2, rtol=3e-2)), f"max abs diff {err}"

    print("KERNEL_OK")
</pallas_src>

<mosaic_0001>
module attributes {stable_mosaic.version = 11 : i64} {
  func.func @kernel(%arg0: i32, %arg1: i32, %arg2: memref<1x16x64xf32, #tpu.memory_space<vmem>>, %arg3: memref<1x8x128xf32, #tpu.memory_space<vmem>>, %arg4: memref<1x1x64xf32, #tpu.memory_space<vmem>>, %arg5: memref<1x1x64xf32, #tpu.memory_space<vmem>>, %arg6: memref<3x64x128xbf16, #tpu.memory_space<vmem>>, %arg7: memref<1x1x128xf32, #tpu.memory_space<vmem>>, %arg8: memref<1x1x64xf32, #tpu.memory_space<vmem>>, %arg9: memref<1x1x64xf32, #tpu.memory_space<vmem>>, %arg10: memref<1x64x128xbf16, #tpu.memory_space<vmem>>, %arg11: memref<1x1x128xf32, #tpu.memory_space<vmem>>, %arg12: memref<1x8x128xf32, #tpu.memory_space<vmem>>, %arg13: memref<1x8x128xf32, #tpu.memory_space<vmem>>, %arg14: memref<16x128xf32, #tpu.memory_space<vmem>>) attributes {dimension_semantics = [#tpu.dimension_semantics<parallel>, #tpu.dimension_semantics<parallel>], iteration_bounds = array<i64: 2, 2>, scalar_prefetch = 0 : i64, scratch_operands = 1 : i64, tpu.core_type = #tpu.core_type<tc>, window_params = [{transform_indices = @transform_0, window_bounds = array<i64: 1, 16, 64>}, {transform_indices = @transform_1, window_bounds = array<i64: 1, 8, 128>}, {pipeline_mode = #tpu.pipeline_mode<synchronous>, transform_indices = @transform_2, window_bounds = array<i64: 1, 1, 64>}, {pipeline_mode = #tpu.pipeline_mode<synchronous>, transform_indices = @transform_3, window_bounds = array<i64: 1, 1, 64>}, {pipeline_mode = #tpu.pipeline_mode<synchronous>, transform_indices = @transform_4, window_bounds = array<i64: 3, 64, 128>}, {pipeline_mode = #tpu.pipeline_mode<synchronous>, transform_indices = @transform_5, window_bounds = array<i64: 1, 1, 128>}, {pipeline_mode = #tpu.pipeline_mode<synchronous>, transform_indices = @transform_6, window_bounds = array<i64: 1, 1, 64>}, {pipeline_mode = #tpu.pipeline_mode<synchronous>, transform_indices = @transform_7, window_bounds = array<i64: 1, 1, 64>}, {pipeline_mode = #tpu.pipeline_mode<synchronous>, transform_indices = @transform_8, window_bounds = array<i64: 1, 64, 128>}, {pipeline_mode = #tpu.pipeline_mode<synchronous>, transform_indices = @transform_9, window_bounds = array<i64: 1, 1, 128>}, {transform_indices = @transform_10, window_bounds = array<i64: 1, 8, 128>}, {transform_indices = @transform_11, window_bounds = array<i64: 1, 8, 128>}]} {
    %c8_i32 = arith.constant 8 : i32
    %0 = arith.muli %arg1, %c8_i32 : i32
    %1 = tpu.assume_multiple %0, 8 : i32
    %c0 = arith.constant 0 : index
    %c0_0 = arith.constant 0 : index
    %c0_1 = arith.constant 0 : index
    %2 = vector.load %arg2[%c0, %c0_0, %c0_1] : memref<1x16x64xf32, #tpu.memory_space<vmem>>, vector<1x16x64xf32>
    %3 = vector.shape_cast %2 : vector<1x16x64xf32> to vector<16x64xf32>
    %4 = tpu.iota {dimensions = array<i32: 0>} : vector<16x16xi32>
    %5 = tpu.iota {dimensions = array<i32: 1>} : vector<16x16xi32>
    %c1_i32 = arith.constant 1 : i32
    %6 = vector.broadcast %c1_i32 : i32 to vector<16x16xi32>
    %7 = arith.addi %5, %6 : vector<16x16xi32>
    %8 = arith.cmpi eq, %4, %7 : vector<16x16xi32>
    %9 = arith.extui %8 : vector<16x16xi1> to vector<16x16xi32>
    %10 = arith.sitofp %9 : vector<16x16xi32> to vector<16x16xf32>
    %11 = arith.truncf %10 : vector<16x16xf32> to vector<16x16xbf16>
    %c1_i32_2 = arith.constant 1 : i32
    %12 = vector.broadcast %c1_i32_2 : i32 to vector<16x16xi32>
    %13 = arith.subi %5, %12 : vector<16x16xi32>
    %14 = arith.cmpi eq, %4, %13 : vector<16x16xi32>
    %15 = arith.extui %14 : vector<16x16xi1> to vector<16x16xi32>
    %16 = arith.sitofp %15 : vector<16x16xi32> to vector<16x16xf32>
    %17 = arith.truncf %16 : vector<16x16xf32> to vector<16x16xbf16>
    %c0_3 = arith.constant 0 : index
    %c0_4 = arith.constant 0 : index
    %c0_5 = arith.constant 0 : index
    %18 = vector.load %arg4[%c0_3, %c0_4, %c0_5] : memref<1x1x64xf32, #tpu.memory_space<vmem>>, vector<1x1x64xf32>
    %19 = vector.shape_cast %18 : vector<1x1x64xf32> to vector<1x64xf32>
    %20 = vector.broadcast %19 : vector<1x64xf32> to vector<16x64xf32>
    %21 = arith.mulf %3, %20 : vector<16x64xf32>
    %c0_6 = arith.constant 0 : index
    %c0_7 = arith.constant 0 : index
    %c0_8 = arith.constant 0 : index
    %22 = vector.load %arg5[%c0_6, %c0_7, %c0_8] : memref<1x1x64xf32, #tpu.memory_space<vmem>>, vector<1x1x64xf32>
    %23 = vector.shape_cast %22 : vector<1x1x64xf32> to vector<1x64xf32>
    %24 = vector.broadcast %23 : vector<1x64xf32> to vector<16x64xf32>
    %25 = arith.addf %21, %24 : vector<16x64xf32>
    %cst = arith.constant 0.000000e+00 : f32
    %26 = vector.broadcast %cst : f32 to vector<16x64xf32>
    %27 = arith.maximumf %25, %26 : vector<16x64xf32>
    %28 = arith.truncf %27 : vector<16x64xf32> to vector<16x64xbf16>
    %cst_9 = arith.constant dense<0.000000e+00> : vector<16x64xf32>
    %29 = tpu.matmul %11, %28, %cst_9 {dimension_numbers = #tpu.dot_dimension_numbers<[1], [0], [0], [1], [0, 0, 1, 1], [], []>} : vector<16x16xbf16>, vector<16x64xbf16>, vector<16x64xf32> -> vector<16x64xf32>
    %30 = arith.truncf %29 : vector<16x64xf32> to vector<16x64xbf16>
    %cst_10 = arith.constant dense<0.000000e+00> : vector<16x64xf32>
    %31 = tpu.matmul %17, %28, %cst_10 {dimension_numbers = #tpu.dot_dimension_numbers<[1], [0], [0], [1], [0, 0, 1, 1], [], []>} : vector<16x16xbf16>, vector<16x64xbf16>, vector<16x64xf32> -> vector<16x64xf32>
    %32 = arith.truncf %31 : vector<16x64xf32> to vector<16x64xbf16>
    %c0_11 = arith.constant 0 : index
    %c0_12 = arith.constant 0 : index
    %c0_13 = arith.constant 0 : index
    %33 = vector.load %arg6[%c0_11, %c0_12, %c0_13] : memref<3x64x128xbf16, #tpu.memory_space<vmem>>, vector<1x64x128xbf16>
    %34 = vector.shape_cast %33 : vector<1x64x128xbf16> to vector<64x128xbf16>
    %cst_14 = arith.constant dense<0.000000e+00> : vector<16x128xf32>
    %35 = tpu.matmul %30, %34, %cst_14 {dimension_numbers = #tpu.dot_dimension_numbers<[1], [0], [0], [1], [0, 0, 1, 1], [], []>} : vector<16x64xbf16>, vector<64x128xbf16>, vector<16x128xf32> -> vector<16x128xf32>
    %c0_15 = arith.constant 0 : index
    %c0_16 = arith.constant 0 : index
    %36 = vector.load %arg14[%c0_15, %c0_16] : memref<16x128xf32, #tpu.memory_space<vmem>>, vector<16x128xf32>
    tpu.vector_store %arg14[%c0_15, %c0_16], %35 {strides = array<i32>} : memref<16x128xf32, #tpu.memory_space<vmem>>, vector<16x128xf32>,
    %c0_17 = arith.constant 0 : index
    %c0_18 = arith.constant 0 : index
    %37 = vector.load %arg14[%c0_17, %c0_18] : memref<16x128xf32, #tpu.memory_space<vmem>>, vector<16x128xf32>
    %c1 = arith.constant 1 : index
    %c0_19 = arith.constant 0 : index
    %c0_20 = arith.constant 0 : index
    %38 = vector.load %arg6[%c1, %c0_19, %c0_20] : memref<3x64x128xbf16, #tpu.memory_space<vmem>>, vector<1x64x128xbf16>
    %39 = vector.shape_cast %38 : vector<1x64x128xbf16> to vector<64x128xbf16>
    %cst_21 = arith.constant dense<0.000000e+00> : vector<16x128xf32>
    %40 = tpu.matmul %28, %39, %cst_21 {dimension_numbers = #tpu.dot_dimension_numbers<[1], [0], [0], [1], [0, 0, 1, 1], [], []>} : vector<16x64xbf16>, vector<64x128xbf16>, vector<16x128xf32> -> vector<16x128xf32>
    %41 = arith.addf %37, %40 : vector<16x128xf32>
    %c0_22 = arith.constant 0 : index
    %c0_23 = arith.constant 0 : index
    %42 = vector.load %arg14[%c0_22, %c0_23] : memref<16x128xf32, #tpu.memory_space<vmem>>, vector<16x128xf32>
    tpu.vector_store %arg14[%c0_22, %c0_23], %41 {strides = array<i32>} : memref<16x128xf32, #tpu.memory_space<vmem>>, vector<16x128xf32>,
    %c0_24 = arith.constant 0 : index
    %c0_25 = arith.constant 0 : index
    %43 = vector.load %arg14[%c0_24, %c0_25] : memref<16x128xf32, #tpu.memory_space<vmem>>, vector<16x128xf32>
    %c2 = arith.constant 2 : index
    %c0_26 = arith.constant 0 : index
    %c0_27 = arith.constant 0 : index
    %44 = vector.load %arg6[%c2, %c0_26, %c0_27] : memref<3x64x128xbf16, #tpu.memory_space<vmem>>, vector<1x64x128xbf16>
    %45 = vector.shape_cast %44 : vector<1x64x128xbf16> to vector<64x128xbf16>
    %cst_28 = arith.constant dense<0.000000e+00> : vector<16x128xf32>
    %46 = tpu.matmul %32, %45, %cst_28 {dimension_numbers = #tpu.dot_dimension_numbers<[1], [0], [0], [1], [0, 0, 1, 1], [], []>} : vector<16x64xbf16>, vector<64x128xbf16>, vector<16x128xf32> -> vector<16x128xf32>
    %47 = arith.addf %43, %46 : vector<16x128xf32>
    %c0_29 = arith.constant 0 : index
    %c0_30 = arith.constant 0 : index
    %48 = vector.load %arg14[%c0_29, %c0_30] : memref<16x128xf32, #tpu.memory_space<vmem>>, vector<16x128xf32>
    tpu.vector_store %arg14[%c0_29, %c0_30], %47 {strides = array<i32>} : memref<16x128xf32, #tpu.memory_space<vmem>>, vector<16x128xf32>,
    %49 = arith.index_cast %1 : i32 to index
    %c0_31 = arith.constant 0 : index
    %50 = vector.load %arg14[%49, %c0_31] : memref<16x128xf32, #tpu.memory_space<vmem>>, vector<8x128xf32>
    %c0_32 = arith.constant 0 : index
    %c0_33 = arith.constant 0 : index
    %c0_34 = arith.constant 0 : index
    %51 = vector.load %arg7[%c0_32, %c0_33, %c0_34] : memref<1x1x128xf32, #tpu.memory_space<vmem>>, vector<1x1x128xf32>
    %52 = vector.shape_cast %51 : vector<1x1x128xf32> to vector<1x128xf32>
    %53 = vector.broadcast %52 : vector<1x128xf32> to vector<8x128xf32>
    %54 = arith.addf %50, %53 : vector<8x128xf32>
    %c0_35 = arith.constant 0 : index
    %c0_36 = arith.constant 0 : index
    %c0_37 = arith.constant 0 : index
    %55 = vector.load %arg3[%c0_35, %c0_36, %c0_37] : memref<1x8x128xf32, #tpu.memory_space<vmem>>, vector<1x8x128xf32>
    %56 = vector.shape_cast %55 : vector<1x8x128xf32> to vector<8x128xf32>
    %57 = arith.addf %54, %56 : vector<8x128xf32>
    %c0_38 = arith.constant 0 : index
    %c0_39 = arith.constant 0 : index
    %c0_40 = arith.constant 0 : index
    %58 = vector.load %arg12[%c0_38, %c0_39, %c0_40] : memref<1x8x128xf32, #tpu.memory_space<vmem>>, vector<1x8x128xf32>
    %59 = vector.shape_cast %58 : vector<1x8x128xf32> to vector<8x128xf32>
    %60 = vector.shape_cast %57 : vector<8x128xf32> to vector<1x8x128xf32>
    tpu.vector_store %arg12[%c0_38, %c0_39, %c0_40], %60 {strides = array<i32>} : memref<1x8x128xf32, #tpu.memory_space<vmem>>, vector<1x8x128xf32>,
    %c0_41 = arith.constant 0 : index
    %c0_42 = arith.constant 0 : index
    %c0_43 = arith.constant 0 : index
    %61 = vector.load %arg8[%c0_41, %c0_42, %c0_43] : memref<1x1x64xf32, #tpu.memory_space<vmem>>, vector<1x1x64xf32>
    %62 = vector.shape_cast %61 : vector<1x1x64xf32> to vector<1x64xf32>
    %63 = vector.broadcast %62 : vector<1x64xf32> to vector<16x64xf32>
    %64 = arith.mulf %3, %63 : vector<16x64xf32>
    %c0_44 = arith.constant 0 : index
    %c0_45 = arith.constant 0 : index
    %c0_46 = arith.constant 0 : index
    %65 = vector.load %arg9[%c0_44, %c0_45, %c0_46] : memref<1x1x64xf32, #tpu.memory_space<vmem>>, vector<1x1x64xf32>
    %66 = vector.shape_cast %65 : vector<1x1x64xf32> to vector<1x64xf32>
    %67 = vector.broadcast %66 : vector<1x64xf32> to vector<16x64xf32>
    %68 = arith.addf %64, %67 : vector<16x64xf32>
    %69 = arith.truncf %68 : vector<16x64xf32> to vector<16x64xbf16>
    %c0_47 = arith.constant 0 : index
    %c0_48 = arith.constant 0 : index
    %c0_49 = arith.constant 0 : index
    %70 = vector.load %arg10[%c0_47, %c0_48, %c0_49] : memref<1x64x128xbf16, #tpu.memory_space<vmem>>, vector<1x64x128xbf16>
    %71 = vector.shape_cast %70 : vector<1x64x128xbf16> to vector<64x128xbf16>
    %cst_50 = arith.constant dense<0.000000e+00> : vector<16x128xf32>
    %72 = tpu.matmul %69, %71, %cst_50 {dimension_numbers = #tpu.dot_dimension_numbers<[1], [0], [0], [1], [0, 0, 1, 1], [], []>} : vector<16x64xbf16>, vector<64x128xbf16>, vector<16x128xf32> -> vector<16x128xf32>
    %c0_51 = arith.constant 0 : index
    %c0_52 = arith.constant 0 : index
    %73 = vector.load %arg14[%c0_51, %c0_52] : memref<16x128xf32, #tpu.memory_space<vmem>>, vector<16x128xf32>
    tpu.vector_store %arg14[%c0_51, %c0_52], %72 {strides = array<i32>} : memref<16x128xf32, #tpu.memory_space<vmem>>, vector<16x128xf32>,
    %74 = arith.index_cast %1 : i32 to index
    %c0_53 = arith.constant 0 : index
    %75 = vector.load %arg14[%74, %c0_53] : memref<16x128xf32, #tpu.memory_space<vmem>>, vector<8x128xf32>
    %c0_54 = arith.constant 0 : index
    %c0_55 = arith.constant 0 : index
    %c0_56 = arith.constant 0 : index
    %76 = vector.load %arg11[%c0_54, %c0_55, %c0_56] : memref<1x1x128xf32, #tpu.memory_space<vmem>>, vector<1x1x128xf32>
    %77 = vector.shape_cast %76 : vector<1x1x128xf32> to vector<1x128xf32>
    %78 = vector.broadcast %77 : vector<1x128xf32> to vector<8x128xf32>
    %79 = arith.addf %75, %78 : vector<8x128xf32>
    %c0_57 = arith.constant 0 : index
    %c0_58 = arith.constant 0 : index
    %c0_59 = arith.constant 0 : index
    %80 = vector.load %arg13[%c0_57, %c0_58, %c0_59] : memref<1x8x128xf32, #tpu.memory_space<vmem>>, vector<1x8x128xf32>
    %81 = vector.shape_cast %80 : vector<1x8x128xf32> to vector<8x128xf32>
    %82 = vector.shape_cast %79 : vector<8x128xf32> to vector<1x8x128xf32>
    tpu.vector_store %arg13[%c0_57, %c0_58, %c0_59], %82 {strides = array<i32>} : memref<1x8x128xf32, #tpu.memory_space<vmem>>, vector<1x8x128xf32>,
    return
  }
  func.func @transform_0(%arg0: i32, %arg1: i32) -> (i32, i32, i32) {
    %c0_i32 = arith.constant 0 : i32
    %c0_i32_0 = arith.constant 0 : i32
    %c0_i32_1 = arith.constant 0 : i32
    return %arg0, %c0_i32, %c0_i32_0 : i32, i32, i32
  }
  func.func @transform_1(%arg0: i32, %arg1: i32) -> (i32, i32, i32) {
    %c0_i32 = arith.constant 0 : i32
    %c0_i32_0 = arith.constant 0 : i32
    return %arg0, %arg1, %c0_i32 : i32, i32, i32
  }
  func.func @transform_2(%arg0: i32, %arg1: i32) -> (i32, i32, i32) {
    %c0_i32 = arith.constant 0 : i32
    %c0_i32_0 = arith.constant 0 : i32
    %c0_i32_1 = arith.constant 0 : i32
    %c0_i32_2 = arith.constant 0 : i32
    return %c0_i32, %c0_i32_0, %c0_i32_1 : i32, i32, i32
  }
  func.func @transform_3(%arg0: i32, %arg1: i32) -> (i32, i32, i32) {
    %c0_i32 = arith.constant 0 : i32
    %c0_i32_0 = arith.constant 0 : i32
    %c0_i32_1 = arith.constant 0 : i32
    %c0_i32_2 = arith.constant 0 : i32
    return %c0_i32, %c0_i32_0, %c0_i32_1 : i32, i32, i32
  }
  func.func @transform_4(%arg0: i32, %arg1: i32) -> (i32, i32, i32) {
    %c0_i32 = arith.constant 0 : i32
    %c0_i32_0 = arith.constant 0 : i32
    %c0_i32_1 = arith.constant 0 : i32
    %c0_i32_2 = arith.constant 0 : i32
    return %c0_i32, %c0_i32_0, %c0_i32_1 : i32, i32, i32
  }
  func.func @transform_5(%arg0: i32, %arg1: i32) -> (i32, i32, i32) {
    %c0_i32 = arith.constant 0 : i32
    %c0_i32_0 = arith.constant 0 : i32
    %c0_i32_1 = arith.constant 0 : i32
    %c0_i32_2 = arith.constant 0 : i32
    return %c0_i32, %c0_i32_0, %c0_i32_1 : i32, i32, i32
  }
  func.func @transform_6(%arg0: i32, %arg1: i32) -> (i32, i32, i32) {
    %c0_i32 = arith.constant 0 : i32
    %c0_i32_0 = arith.constant 0 : i32
    %c0_i32_1 = arith.constant 0 : i32
    %c0_i32_2 = arith.constant 0 : i32
    return %c0_i32, %c0_i32_0, %c0_i32_1 : i32, i32, i32
  }
  func.func @transform_7(%arg0: i32, %arg1: i32) -> (i32, i32, i32) {
    %c0_i32 = arith.constant 0 : i32
    %c0_i32_0 = arith.constant 0 : i32
    %c0_i32_1 = arith.constant 0 : i32
    %c0_i32_2 = arith.constant 0 : i32
    return %c0_i32, %c0_i32_0, %c0_i32_1 : i32, i32, i32
  }
  func.func @transform_8(%arg0: i32, %arg1: i32) -> (i32, i32, i32) {
    %c0_i32 = arith.constant 0 : i32
    %c0_i32_0 = arith.constant 0 : i32
    %c0_i32_1 = arith.constant 0 : i32
    %c0_i32_2 = arith.constant 0 : i32
    return %c0_i32, %c0_i32_0, %c0_i32_1 : i32, i32, i32
  }
  func.func @transform_9(%arg0: i32, %arg1: i32) -> (i32, i32, i32) {
    %c0_i32 = arith.constant 0 : i32
    %c0_i32_0 = arith.constant 0 : i32
    %c0_i32_1 = arith.constant 0 : i32
    %c0_i32_2 = arith.constant 0 : i32
    return %c0_i32, %c0_i32_0, %c0_i32_1 : i32, i32, i32
  }
  func.func @transform_10(%arg0: i32, %arg1: i32) -> (i32, i32, i32) {
    %c0_i32 = arith.constant 0 : i32
    %c0_i32_0 = arith.constant 0 : i32
    return %arg0, %arg1, %c0_i32 : i32, i32, i32
  }
  func.func @transform_11(%arg0: i32, %arg1: i32) -> (i32, i32, i32) {
    %c0_i32 = arith.constant 0 : i32
    %c0_i32_0 = arith.constant 0 : i32
    return %arg0, %arg1, %c0_i32 : i32, i32, i32
  }
}

module attributes {stable_mosaic.version = 11 : i64} {
  func.func @kernel(%arg0: i32, %arg1: i32, %arg2: memref<1x16x128xf32, #tpu.memory_space<vmem>>, %arg3: memref<1x8x128xf32, #tpu.memory_space<vmem>>, %arg4: memref<1x1x128xf32, #tpu.memory_space<vmem>>, %arg5: memref<1x1x128xf32, #tpu.memory_space<vmem>>, %arg6: memref<3x128x128xbf16, #tpu.memory_space<vmem>>, %arg7: memref<1x1x128xf32, #tpu.memory_space<vmem>>, %arg8: memref<1x8x128xf32, #tpu.memory_space<vmem>>, %arg9: memref<16x128xf32, #tpu.memory_space<vmem>>) attributes {dimension_semantics = [#tpu.dimension_semantics<parallel>, #tpu.dimension_semantics<parallel>], iteration_bounds = array<i64: 2, 2>, scalar_prefetch = 0 : i64, scratch_operands = 1 : i64, tpu.core_type = #tpu.core_type<tc>, window_params = [{transform_indices = @transform_0, window_bounds = array<i64: 1, 16, 128>}, {transform_indices = @transform_1, window_bounds = array<i64: 1, 8, 128>}, {pipeline_mode = #tpu.pipeline_mode<synchronous>, transform_indices = @transform_2, window_bounds = array<i64: 1, 1, 128>}, {transform_indices = @transform_3, window_bounds = array<i64: 1, 1, 128>}, {pipeline_mode = #tpu.pipeline_mode<synchronous>, transform_indices = @transform_4, window_bounds = array<i64: 3, 128, 128>}, {pipeline_mode = #tpu.pipeline_mode<synchronous>, transform_indices = @transform_5, window_bounds = array<i64: 1, 1, 128>}, {transform_indices = @transform_6, window_bounds = array<i64: 1, 8, 128>}]} {
    %c8_i32 = arith.constant 8 : i32
    %0 = arith.muli %arg1, %c8_i32 : i32
    %1 = tpu.assume_multiple %0, 8 : i32
    %c0 = arith.constant 0 : index
    %c0_0 = arith.constant 0 : index
    %c0_1 = arith.constant 0 : index
    %2 = vector.load %arg2[%c0, %c0_0, %c0_1] : memref<1x16x128xf32, #tpu.memory_space<vmem>>, vector<1x16x128xf32>
    %3 = vector.shape_cast %2 : vector<1x16x128xf32> to vector<16x128xf32>
    %4 = tpu.iota {dimensions = array<i32: 0>} : vector<16x16xi32>
    %5 = tpu.iota {dimensions = array<i32: 1>} : vector<16x16xi32>
    %c1_i32 = arith.constant 1 : i32
    %6 = vector.broadcast %c1_i32 : i32 to vector<16x16xi32>
    %7 = arith.addi %5, %6 : vector<16x16xi32>
    %8 = arith.cmpi eq, %4, %7 : vector<16x16xi32>
    %9 = arith.extui %8 : vector<16x16xi1> to vector<16x16xi32>
    %10 = arith.sitofp %9 : vector<16x16xi32> to vector<16x16xf32>
    %11 = arith.truncf %10 : vector<16x16xf32> to vector<16x16xbf16>
    %c1_i32_2 = arith.constant 1 : i32
    %12 = vector.broadcast %c1_i32_2 : i32 to vector<16x16xi32>
    %13 = arith.subi %5, %12 : vector<16x16xi32>
    %14 = arith.cmpi eq, %4, %13 : vector<16x16xi32>
    %15 = arith.extui %14 : vector<16x16xi1> to vector<16x16xi32>
    %16 = arith.sitofp %15 : vector<16x16xi32> to vector<16x16xf32>
    %17 = arith.truncf %16 : vector<16x16xf32> to vector<16x16xbf16>
    %c0_3 = arith.constant 0 : index
    %c0_4 = arith.constant 0 : index
    %c0_5 = arith.constant 0 : index
    %18 = vector.load %arg4[%c0_3, %c0_4, %c0_5] : memref<1x1x128xf32, #tpu.memory_space<vmem>>, vector<1x1x128xf32>
    %19 = vector.shape_cast %18 : vector<1x1x128xf32> to vector<1x128xf32>
    %20 = vector.broadcast %19 : vector<1x128xf32> to vector<16x128xf32>
    %21 = arith.mulf %3, %20 : vector<16x128xf32>
    %c0_6 = arith.constant 0 : index
    %c0_7 = arith.constant 0 : index
    %c0_8 = arith.constant 0 : index
    %22 = vector.load %arg5[%c0_6, %c0_7, %c0_8] : memref<1x1x128xf32, #tpu.memory_space<vmem>>, vector<1x1x128xf32>
    %23 = vector.shape_cast %22 : vector<1x1x128xf32> to vector<1x128xf32>
    %24 = vector.broadcast %23 : vector<1x128xf32> to vector<16x128xf32>
    %25 = arith.addf %21, %24 : vector<16x128xf32>
    %cst = arith.constant 0.000000e+00 : f32
    %26 = vector.broadcast %cst : f32 to vector<16x128xf32>
    %27 = arith.maximumf %25, %26 : vector<16x128xf32>
    %28 = arith.truncf %27 : vector<16x128xf32> to vector<16x128xbf16>
    %cst_9 = arith.constant dense<0.000000e+00> : vector<16x128xf32>
    %29 = tpu.matmul %11, %28, %cst_9 {dimension_numbers = #tpu.dot_dimension_numbers<[1], [0], [0], [1], [0, 0, 1, 1], [], []>} : vector<16x16xbf16>, vector<16x128xbf16>, vector<16x128xf32> -> vector<16x128xf32>
    %30 = arith.truncf %29 : vector<16x128xf32> to vector<16x128xbf16>
    %cst_10 = arith.constant dense<0.000000e+00> : vector<16x128xf32>
    %31 = tpu.matmul %17, %28, %cst_10 {dimension_numbers = #tpu.dot_dimension_numbers<[1], [0], [0], [1], [0, 0, 1, 1], [], []>} : vector<16x16xbf16>, vector<16x128xbf16>, vector<16x128xf32> -> vector<16x128xf32>
    %32 = arith.truncf %31 : vector<16x128xf32> to vector<16x128xbf16>
    %c0_11 = arith.constant 0 : index
    %c0_12 = arith.constant 0 : index
    %c0_13 = arith.constant 0 : index
    %33 = vector.load %arg6[%c0_11, %c0_12, %c0_13] : memref<3x128x128xbf16, #tpu.memory_space<vmem>>, vector<1x128x128xbf16>
    %34 = vector.shape_cast %33 : vector<1x128x128xbf16> to vector<128x128xbf16>
    %cst_14 = arith.constant dense<0.000000e+00> : vector<16x128xf32>
    %35 = tpu.matmul %30, %34, %cst_14 {dimension_numbers = #tpu.dot_dimension_numbers<[1], [0], [0], [1], [0, 0, 1, 1], [], []>} : vector<16x128xbf16>, vector<128x128xbf16>, vector<16x128xf32> -> vector<16x128xf32>
    %c0_15 = arith.constant 0 : index
    %c0_16 = arith.constant 0 : index
    %36 = vector.load %arg9[%c0_15, %c0_16] : memref<16x128xf32, #tpu.memory_space<vmem>>, vector<16x128xf32>
    tpu.vector_store %arg9[%c0_15, %c0_16], %35 {strides = array<i32>} : memref<16x128xf32, #tpu.memory_space<vmem>>, vector<16x128xf32>,
    %c0_17 = arith.constant 0 : index
    %c0_18 = arith.constant 0 : index
    %37 = vector.load %arg9[%c0_17, %c0_18] : memref<16x128xf32, #tpu.memory_space<vmem>>, vector<16x128xf32>
    %c1 = arith.constant 1 : index
    %c0_19 = arith.constant 0 : index
    %c0_20 = arith.constant 0 : index
    %38 = vector.load %arg6[%c1, %c0_19, %c0_20] : memref<3x128x128xbf16, #tpu.memory_space<vmem>>, vector<1x128x128xbf16>
    %39 = vector.shape_cast %38 : vector<1x128x128xbf16> to vector<128x128xbf16>
    %cst_21 = arith.constant dense<0.000000e+00> : vector<16x128xf32>
    %40 = tpu.matmul %28, %39, %cst_21 {dimension_numbers = #tpu.dot_dimension_numbers<[1], [0], [0], [1], [0, 0, 1, 1], [], []>} : vector<16x128xbf16>, vector<128x128xbf16>, vector<16x128xf32> -> vector<16x128xf32>
    %41 = arith.addf %37, %40 : vector<16x128xf32>
    %c0_22 = arith.constant 0 : index
    %c0_23 = arith.constant 0 : index
    %42 = vector.load %arg9[%c0_22, %c0_23] : memref<16x128xf32, #tpu.memory_space<vmem>>, vector<16x128xf32>
    tpu.vector_store %arg9[%c0_22, %c0_23], %41 {strides = array<i32>} : memref<16x128xf32, #tpu.memory_space<vmem>>, vector<16x128xf32>,
    %c0_24 = arith.constant 0 : index
    %c0_25 = arith.constant 0 : index
    %43 = vector.load %arg9[%c0_24, %c0_25] : memref<16x128xf32, #tpu.memory_space<vmem>>, vector<16x128xf32>
    %c2 = arith.constant 2 : index
    %c0_26 = arith.constant 0 : index
    %c0_27 = arith.constant 0 : index
    %44 = vector.load %arg6[%c2, %c0_26, %c0_27] : memref<3x128x128xbf16, #tpu.memory_space<vmem>>, vector<1x128x128xbf16>
    %45 = vector.shape_cast %44 : vector<1x128x128xbf16> to vector<128x128xbf16>
    %cst_28 = arith.constant dense<0.000000e+00> : vector<16x128xf32>
    %46 = tpu.matmul %32, %45, %cst_28 {dimension_numbers = #tpu.dot_dimension_numbers<[1], [0], [0], [1], [0, 0, 1, 1], [], []>} : vector<16x128xbf16>, vector<128x128xbf16>, vector<16x128xf32> -> vector<16x128xf32>
    %47 = arith.addf %43, %46 : vector<16x128xf32>
    %c0_29 = arith.constant 0 : index
    %c0_30 = arith.constant 0 : index
    %48 = vector.load %arg9[%c0_29, %c0_30] : memref<16x128xf32, #tpu.memory_space<vmem>>, vector<16x128xf32>
    tpu.vector_store %arg9[%c0_29, %c0_30], %47 {strides = array<i32>} : memref<16x128xf32, #tpu.memory_space<vmem>>, vector<16x128xf32>,
    %49 = arith.index_cast %1 : i32 to index
    %c0_31 = arith.constant 0 : index
    %50 = vector.load %arg9[%49, %c0_31] : memref<16x128xf32, #tpu.memory_space<vmem>>, vector<8x128xf32>
    %c0_32 = arith.constant 0 : index
    %c0_33 = arith.constant 0 : index
    %c0_34 = arith.constant 0 : index
    %51 = vector.load %arg7[%c0_32, %c0_33, %c0_34] : memref<1x1x128xf32, #tpu.memory_space<vmem>>, vector<1x1x128xf32>
    %52 = vector.shape_cast %51 : vector<1x1x128xf32> to vector<1x128xf32>
    %53 = vector.broadcast %52 : vector<1x128xf32> to vector<8x128xf32>
    %54 = arith.addf %50, %53 : vector<8x128xf32>
    %c0_35 = arith.constant 0 : index
    %c0_36 = arith.constant 0 : index
    %c0_37 = arith.constant 0 : index
    %55 = vector.load %arg3[%c0_35, %c0_36, %c0_37] : memref<1x8x128xf32, #tpu.memory_space<vmem>>, vector<1x8x128xf32>
    %56 = vector.shape_cast %55 : vector<1x8x128xf32> to vector<8x128xf32>
    %57 = arith.addf %54, %56 : vector<8x128xf32>
    %c0_38 = arith.constant 0 : index
    %c0_39 = arith.constant 0 : index
    %c0_40 = arith.constant 0 : index
    %58 = vector.load %arg8[%c0_38, %c0_39, %c0_40] : memref<1x8x128xf32, #tpu.memory_space<vmem>>, vector<1x8x128xf32>
    %59 = vector.shape_cast %58 : vector<1x8x128xf32> to vector<8x128xf32>
    %60 = vector.shape_cast %57 : vector<8x128xf32> to vector<1x8x128xf32>
    tpu.vector_store %arg8[%c0_38, %c0_39, %c0_40], %60 {strides = array<i32>} : memref<1x8x128xf32, #tpu.memory_space<vmem>>, vector<1x8x128xf32>,
    return
  }
  func.func @transform_0(%arg0: i32, %arg1: i32) -> (i32, i32, i32) {
    %c0_i32 = arith.constant 0 : i32
    %c0_i32_0 = arith.constant 0 : i32
    %c0_i32_1 = arith.constant 0 : i32
    return %arg0, %c0_i32, %c0_i32_0 : i32, i32, i32
  }
  func.func @transform_1(%arg0: i32, %arg1: i32) -> (i32, i32, i32) {
    %c0_i32 = arith.constant 0 : i32
    %c0_i32_0 = arith.constant 0 : i32
    return %arg0, %arg1, %c0_i32 : i32, i32, i32
  }
  func.func @transform_2(%arg0: i32, %arg1: i32) -> (i32, i32, i32) {
    %c0_i32 = arith.constant 0 : i32
    %c0_i32_0 = arith.constant 0 : i32
    %c0_i32_1 = arith.constant 0 : i32
    %c0_i32_2 = arith.constant 0 : i32
    return %c0_i32, %c0_i32_0, %c0_i32_1 : i32, i32, i32
  }
  func.func @transform_3(%arg0: i32, %arg1: i32) -> (i32, i32, i32) {
    %c0_i32 = arith.constant 0 : i32
    %c0_i32_0 = arith.constant 0 : i32
    %c0_i32_1 = arith.constant 0 : i32
    return %arg0, %c0_i32, %c0_i32_0 : i32, i32, i32
  }
  func.func @transform_4(%arg0: i32, %arg1: i32) -> (i32, i32, i32) {
    %c0_i32 = arith.constant 0 : i32
    %c0_i32_0 = arith.constant 0 : i32
    %c0_i32_1 = arith.constant 0 : i32
    %c0_i32_2 = arith.constant 0 : i32
    return %c0_i32, %c0_i32_0, %c0_i32_1 : i32, i32, i32
  }
  func.func @transform_5(%arg0: i32, %arg1: i32) -> (i32, i32, i32) {
    %c0_i32 = arith.constant 0 : i32
    %c0_i32_0 = arith.constant 0 : i32
    %c0_i32_1 = arith.constant 0 : i32
    %c0_i32_2 = arith.constant 0 : i32
    return %c0_i32, %c0_i32_0, %c0_i32_1 : i32, i32, i32
  }
  func.func @transform_6(%arg0: i32, %arg1: i32) -> (i32, i32, i32) {
    %c0_i32 = arith.constant 0 : i32
    %c0_i32_0 = arith.constant 0 : i32
    return %arg0, %arg1, %c0_i32 : i32, i32, i32
  }
}

module attributes {stable_mosaic.version = 11 : i64} {
  func.func @kernel(%arg0: i32, %arg1: i32, %arg2: memref<1x16x128xf32, #tpu.memory_space<vmem>>, %arg3: memref<1x1x128xf32, #tpu.memory_space<vmem>>, %arg4: memref<1x1x128xf32, #tpu.memory_space<vmem>>, %arg5: memref<3x128x128xbf16, #tpu.memory_space<vmem>>, %arg6: memref<1x1x128xf32, #tpu.memory_space<vmem>>, %arg7: memref<1x1x128xf32, #tpu.memory_space<vmem>>, %arg8: memref<1x1x128xf32, #tpu.memory_space<vmem>>, %arg9: memref<3x128x128xbf16, #tpu.memory_space<vmem>>, %arg10: memref<1x1x128xf32, #tpu.memory_space<vmem>>, %arg11: memref<1x8x128xf32, #tpu.memory_space<vmem>>, %arg12: memref<16x128xf32, #tpu.memory_space<vmem>>) attributes {dimension_semantics = [#tpu.dimension_semantics<parallel>, #tpu.dimension_semantics<parallel>], iteration_bounds = array<i64: 2, 2>, scalar_prefetch = 0 : i64, scratch_operands = 1 : i64, tpu.core_type = #tpu.core_type<tc>, window_params = [{transform_indices = @transform_0, window_bounds = array<i64: 1, 16, 128>}, {pipeline_mode = #tpu.pipeline_mode<synchronous>, transform_indices = @transform_1, window_bounds = array<i64: 1, 1, 128>}, {transform_indices = @transform_2, window_bounds = array<i64: 1, 1, 128>}, {pipeline_mode = #tpu.pipeline_mode<synchronous>, transform_indices = @transform_3, window_bounds = array<i64: 3, 128, 128>}, {pipeline_mode = #tpu.pipeline_mode<synchronous>, transform_indices = @transform_4, window_bounds = array<i64: 1, 1, 128>}, {pipeline_mode = #tpu.pipeline_mode<synchronous>, transform_indices = @transform_5, window_bounds = array<i64: 1, 1, 128>}, {transform_indices = @transform_6, window_bounds = array<i64: 1, 1, 128>}, {pipeline_mode = #tpu.pipeline_mode<synchronous>, transform_indices = @transform_7, window_bounds = array<i64: 3, 128, 128>}, {pipeline_mode = #tpu.pipeline_mode<synchronous>, transform_indices = @transform_8, window_bounds = array<i64: 1, 1, 128>}, {transform_indices = @transform_9, window_bounds = array<i64: 1, 8, 128>}]} {
    %c8_i32 = arith.constant 8 : i32
    %0 = arith.muli %arg1, %c8_i32 : i32
    %1 = tpu.assume_multiple %0, 8 : i32
    %c0 = arith.constant 0 : index
    %c0_0 = arith.constant 0 : index
    %c0_1 = arith.constant 0 : index
    %2 = vector.load %arg2[%c0, %c0_0, %c0_1] : memref<1x16x128xf32, #tpu.memory_space<vmem>>, vector<1x16x128xf32>
    %3 = vector.shape_cast %2 : vector<1x16x128xf32> to vector<16x128xf32>
    %4 = tpu.iota {dimensions = array<i32: 0>} : vector<16x16xi32>
    %5 = tpu.iota {dimensions = array<i32: 1>} : vector<16x16xi32>
    %c1_i32 = arith.constant 1 : i32
    %6 = vector.broadcast %c1_i32 : i32 to vector<16x16xi32>
    %7 = arith.addi %5, %6 : vector<16x16xi32>
    %8 = arith.cmpi eq, %4, %7 : vector<16x16xi32>
    %9 = arith.extui %8 : vector<16x16xi1> to vector<16x16xi32>
    %10 = arith.sitofp %9 : vector<16x16xi32> to vector<16x16xf32>
    %11 = arith.truncf %10 : vector<16x16xf32> to vector<16x16xbf16>
    %c1_i32_2 = arith.constant 1 : i32
    %12 = vector.broadcast %c1_i32_2 : i32 to vector<16x16xi32>
    %13 = arith.subi %5, %12 : vector<16x16xi32>
    %14 = arith.cmpi eq, %4, %13 : vector<16x16xi32>
    %15 = arith.extui %14 : vector<16x16xi1> to vector<16x16xi32>
    %16 = arith.sitofp %15 : vector<16x16xi32> to vector<16x16xf32>
    %17 = arith.truncf %16 : vector<16x16xf32> to vector<16x16xbf16>
    %c0_3 = arith.constant 0 : index
    %c0_4 = arith.constant 0 : index
    %c0_5 = arith.constant 0 : index
    %18 = vector.load %arg3[%c0_3, %c0_4, %c0_5] : memref<1x1x128xf32, #tpu.memory_space<vmem>>, vector<1x1x128xf32>
    %19 = vector.shape_cast %18 : vector<1x1x128xf32> to vector<1x128xf32>
    %20 = vector.broadcast %19 : vector<1x128xf32> to vector<16x128xf32>
    %21 = arith.mulf %3, %20 : vector<16x128xf32>
    %c0_6 = arith.constant 0 : index
    %c0_7 = arith.constant 0 : index
    %c0_8 = arith.constant 0 : index
    %22 = vector.load %arg4[%c0_6, %c0_7, %c0_8] : memref<1x1x128xf32, #tpu.memory_space<vmem>>, vector<1x1x128xf32>
    %23 = vector.shape_cast %22 : vector<1x1x128xf32> to vector<1x128xf32>
    %24 = vector.broadcast %23 : vector<1x128xf32> to vector<16x128xf32>
    %25 = arith.addf %21, %24 : vector<16x128xf32>
    %cst = arith.constant 0.000000e+00 : f32
    %26 = vector.broadcast %cst : f32 to vector<16x128xf32>
    %27 = arith.maximumf %25, %26 : vector<16x128xf32>
    %28 = arith.truncf %27 : vector<16x128xf32> to vector<16x128xbf16>
    %cst_9 = arith.constant dense<0.000000e+00> : vector<16x128xf32>
    %29 = tpu.matmul %11, %28, %cst_9 {dimension_numbers = #tpu.dot_dimension_numbers<[1], [0], [0], [1], [0, 0, 1, 1], [], []>} : vector<16x16xbf16>, vector<16x128xbf16>, vector<16x128xf32> -> vector<16x128xf32>
    %30 = arith.truncf %29 : vector<16x128xf32> to vector<16x128xbf16>
    %cst_10 = arith.constant dense<0.000000e+00> : vector<16x128xf32>
    %31 = tpu.matmul %17, %28, %cst_10 {dimension_numbers = #tpu.dot_dimension_numbers<[1], [0], [0], [1], [0, 0, 1, 1], [], []>} : vector<16x16xbf16>, vector<16x128xbf16>, vector<16x128xf32> -> vector<16x128xf32>
    %32 = arith.truncf %31 : vector<16x128xf32> to vector<16x128xbf16>
    %c0_11 = arith.constant 0 : index
    %c0_12 = arith.constant 0 : index
    %c0_13 = arith.constant 0 : index
    %33 = vector.load %arg5[%c0_11, %c0_12, %c0_13] : memref<3x128x128xbf16, #tpu.memory_space<vmem>>, vector<1x128x128xbf16>
    %34 = vector.shape_cast %33 : vector<1x128x128xbf16> to vector<128x128xbf16>
    %cst_14 = arith.constant dense<0.000000e+00> : vector<16x128xf32>
    %35 = tpu.matmul %30, %34, %cst_14 {dimension_numbers = #tpu.dot_dimension_numbers<[1], [0], [0], [1], [0, 0, 1, 1], [], []>} : vector<16x128xbf16>, vector<128x128xbf16>, vector<16x128xf32> -> vector<16x128xf32>
    %c0_15 = arith.constant 0 : index
    %c0_16 = arith.constant 0 : index
    %36 = vector.load %arg12[%c0_15, %c0_16] : memref<16x128xf32, #tpu.memory_space<vmem>>, vector<16x128xf32>
    tpu.vector_store %arg12[%c0_15, %c0_16], %35 {strides = array<i32>} : memref<16x128xf32, #tpu.memory_space<vmem>>, vector<16x128xf32>,
    %c0_17 = arith.constant 0 : index
    %c0_18 = arith.constant 0 : index
    %37 = vector.load %arg12[%c0_17, %c0_18] : memref<16x128xf32, #tpu.memory_space<vmem>>, vector<16x128xf32>
    %c1 = arith.constant 1 : index
    %c0_19 = arith.constant 0 : index
    %c0_20 = arith.constant 0 : index
    %38 = vector.load %arg5[%c1, %c0_19, %c0_20] : memref<3x128x128xbf16, #tpu.memory_space<vmem>>, vector<1x128x128xbf16>
    %39 = vector.shape_cast %38 : vector<1x128x128xbf16> to vector<128x128xbf16>
    %cst_21 = arith.constant dense<0.000000e+00> : vector<16x128xf32>
    %40 = tpu.matmul %28, %39, %cst_21 {dimension_numbers = #tpu.dot_dimension_numbers<[1], [0], [0], [1], [0, 0, 1, 1], [], []>} : vector<16x128xbf16>, vector<128x128xbf16>, vector<16x128xf32> -> vector<16x128xf32>
    %41 = arith.addf %37, %40 : vector<16x128xf32>
    %c0_22 = arith.constant 0 : index
    %c0_23 = arith.constant 0 : index
    %42 = vector.load %arg12[%c0_22, %c0_23] : memref<16x128xf32, #tpu.memory_space<vmem>>, vector<16x128xf32>
    tpu.vector_store %arg12[%c0_22, %c0_23], %41 {strides = array<i32>} : memref<16x128xf32, #tpu.memory_space<vmem>>, vector<16x128xf32>,
    %c0_24 = arith.constant 0 : index
    %c0_25 = arith.constant 0 : index
    %43 = vector.load %arg12[%c0_24, %c0_25] : memref<16x128xf32, #tpu.memory_space<vmem>>, vector<16x128xf32>
    %c2 = arith.constant 2 : index
    %c0_26 = arith.constant 0 : index
    %c0_27 = arith.constant 0 : index
    %44 = vector.load %arg5[%c2, %c0_26, %c0_27] : memref<3x128x128xbf16, #tpu.memory_space<vmem>>, vector<1x128x128xbf16>
    %45 = vector.shape_cast %44 : vector<1x128x128xbf16> to vector<128x128xbf16>
    %cst_28 = arith.constant dense<0.000000e+00> : vector<16x128xf32>
    %46 = tpu.matmul %32, %45, %cst_28 {dimension_numbers = #tpu.dot_dimension_numbers<[1], [0], [0], [1], [0, 0, 1, 1], [], []>} : vector<16x128xbf16>, vector<128x128xbf16>, vector<16x128xf32> -> vector<16x128xf32>
    %47 = arith.addf %43, %46 : vector<16x128xf32>
    %c0_29 = arith.constant 0 : index
    %c0_30 = arith.constant 0 : index
    %48 = vector.load %arg12[%c0_29, %c0_30] : memref<16x128xf32, #tpu.memory_space<vmem>>, vector<16x128xf32>
    tpu.vector_store %arg12[%c0_29, %c0_30], %47 {strides = array<i32>} : memref<16x128xf32, #tpu.memory_space<vmem>>, vector<16x128xf32>,
    %c0_31 = arith.constant 0 : index
    %c0_32 = arith.constant 0 : index
    %49 = vector.load %arg12[%c0_31, %c0_32] : memref<16x128xf32, #tpu.memory_space<vmem>>, vector<16x128xf32>
    %c0_33 = arith.constant 0 : index
    %c0_34 = arith.constant 0 : index
    %c0_35 = arith.constant 0 : index
    %50 = vector.load %arg6[%c0_33, %c0_34, %c0_35] : memref<1x1x128xf32, #tpu.memory_space<vmem>>, vector<1x1x128xf32>
    %51 = vector.shape_cast %50 : vector<1x1x128xf32> to vector<1x128xf32>
    %52 = vector.broadcast %51 : vector<1x128xf32> to vector<16x128xf32>
    %53 = arith.addf %49, %52 : vector<16x128xf32>
    %c0_36 = arith.constant 0 : index
    %c0_37 = arith.constant 0 : index
    %c0_38 = arith.constant 0 : index
    %54 = vector.load %arg7[%c0_36, %c0_37, %c0_38] : memref<1x1x128xf32, #tpu.memory_space<vmem>>, vector<1x1x128xf32>
    %55 = vector.shape_cast %54 : vector<1x1x128xf32> to vector<1x128xf32>
    %56 = vector.broadcast %55 : vector<1x128xf32> to vector<16x128xf32>
    %57 = arith.mulf %53, %56 : vector<16x128xf32>
    %c0_39 = arith.constant 0 : index
    %c0_40 = arith.constant 0 : index
    %c0_41 = arith.constant 0 : index
    %58 = vector.load %arg8[%c0_39, %c0_40, %c0_41] : memref<1x1x128xf32, #tpu.memory_space<vmem>>, vector<1x1x128xf32>
    %59 = vector.shape_cast %58 : vector<1x1x128xf32> to vector<1x128xf32>
    %60 = vector.broadcast %59 : vector<1x128xf32> to vector<16x128xf32>
    %61 = arith.addf %57, %60 : vector<16x128xf32>
    %cst_42 = arith.constant 0.000000e+00 : f32
    %62 = vector.broadcast %cst_42 : f32 to vector<16x128xf32>
    %63 = arith.maximumf %61, %62 : vector<16x128xf32>
    %64 = arith.truncf %63 : vector<16x128xf32> to vector<16x128xbf16>
    %cst_43 = arith.constant dense<0.000000e+00> : vector<16x128xf32>
    %65 = tpu.matmul %11, %64, %cst_43 {dimension_numbers = #tpu.dot_dimension_numbers<[1], [0], [0], [1], [0, 0, 1, 1], [], []>} : vector<16x16xbf16>, vector<16x128xbf16>, vector<16x128xf32> -> vector<16x128xf32>
    %66 = arith.truncf %65 : vector<16x128xf32> to vector<16x128xbf16>
    %cst_44 = arith.constant dense<0.000000e+00> : vector<16x128xf32>
    %67 = tpu.matmul %17, %64, %cst_44 {dimension_numbers = #tpu.dot_dimension_numbers<[1], [0], [0], [1], [0, 0, 1, 1], [], []>} : vector<16x16xbf16>, vector<16x128xbf16>, vector<16x128xf32> -> vector<16x128xf32>
    %68 = arith.truncf %67 : vector<16x128xf32> to vector<16x128xbf16>
    %c0_45 = arith.constant 0 : index
    %c0_46 = arith.constant 0 : index
    %c0_47 = arith.constant 0 : index
    %69 = vector.load %arg9[%c0_45, %c0_46, %c0_47] : memref<3x128x128xbf16, #tpu.memory_space<vmem>>, vector<1x128x128xbf16>
    %70 = vector.shape_cast %69 : vector<1x128x128xbf16> to vector<128x128xbf16>
    %cst_48 = arith.constant dense<0.000000e+00> : vector<16x128xf32>
    %71 = tpu.matmul %66, %70, %cst_48 {dimension_numbers = #tpu.dot_dimension_numbers<[1], [0], [0], [1], [0, 0, 1, 1], [], []>} : vector<16x128xbf16>, vector<128x128xbf16>, vector<16x128xf32> -> vector<16x128xf32>
    %c0_49 = arith.constant 0 : index
    %c0_50 = arith.constant 0 : index
    %72 = vector.load %arg12[%c0_49, %c0_50] : memref<16x128xf32, #tpu.memory_space<vmem>>, vector<16x128xf32>
    tpu.vector_store %arg12[%c0_49, %c0_50], %71 {strides = array<i32>} : memref<16x128xf32, #tpu.memory_space<vmem>>, vector<16x128xf32>,
    %c0_51 = arith.constant 0 : index
    %c0_52 = arith.constant 0 : index
    %73 = vector.load %arg12[%c0_51, %c0_52] : memref<16x128xf32, #tpu.memory_space<vmem>>, vector<16x128xf32>
    %c1_53 = arith.constant 1 : index
    %c0_54 = arith.constant 0 : index
    %c0_55 = arith.constant 0 : index
    %74 = vector.load %arg9[%c1_53, %c0_54, %c0_55] : memref<3x128x128xbf16, #tpu.memory_space<vmem>>, vector<1x128x128xbf16>
    %75 = vector.shape_cast %74 : vector<1x128x128xbf16> to vector<128x128xbf16>
    %cst_56 = arith.constant dense<0.000000e+00> : vector<16x128xf32>
    %76 = tpu.matmul %64, %75, %cst_56 {dimension_numbers = #tpu.dot_dimension_numbers<[1], [0], [0], [1], [0, 0, 1, 1], [], []>} : vector<16x128xbf16>, vector<128x128xbf16>, vector<16x128xf32> -> vector<16x128xf32>
    %77 = arith.addf %73, %76 : vector<16x128xf32>
    %c0_57 = arith.constant 0 : index
    %c0_58 = arith.constant 0 : index
    %78 = vector.load %arg12[%c0_57, %c0_58] : memref<16x128xf32, #tpu.memory_space<vmem>>, vector<16x128xf32>
    tpu.vector_store %arg12[%c0_57, %c0_58], %77 {strides = array<i32>} : memref<16x128xf32, #tpu.memory_space<vmem>>, vector<16x128xf32>,
    %c0_59 = arith.constant 0 : index
    %c0_60 = arith.constant 0 : index
    %79 = vector.load %arg12[%c0_59, %c0_60] : memref<16x128xf32, #tpu.memory_space<vmem>>, vector<16x128xf32>
    %c2_61 = arith.constant 2 : index
    %c0_62 = arith.constant 0 : index
    %c0_63 = arith.constant 0 : index
    %80 = vector.load %arg9[%c2_61, %c0_62, %c0_63] : memref<3x128x128xbf16, #tpu.memory_space<vmem>>, vector<1x128x128xbf16>
    %81 = vector.shape_cast %80 : vector<1x128x128xbf16> to vector<128x128xbf16>
    %cst_64 = arith.constant dense<0.000000e+00> : vector<16x128xf32>
    %82 = tpu.matmul %68, %81, %cst_64 {dimension_numbers = #tpu.dot_dimension_numbers<[1], [0], [0], [1], [0, 0, 1, 1], [], []>} : vector<16x128xbf16>, vector<128x128xbf16>, vector<16x128xf32> -> vector<16x128xf32>
    %83 = arith.addf %79, %82 : vector<16x128xf32>
    %c0_65 = arith.constant 0 : index
    %c0_66 = arith.constant 0 : index
    %84 = vector.load %arg12[%c0_65, %c0_66] : memref<16x128xf32, #tpu.memory_space<vmem>>, vector<16x128xf32>
    tpu.vector_store %arg12[%c0_65, %c0_66], %83 {strides = array<i32>} : memref<16x128xf32, #tpu.memory_space<vmem>>, vector<16x128xf32>,
    %85 = arith.index_cast %1 : i32 to index
    %c0_67 = arith.constant 0 : index
    %86 = vector.load %arg12[%85, %c0_67] : memref<16x128xf32, #tpu.memory_space<vmem>>, vector<8x128xf32>
    %c0_68 = arith.constant 0 : index
    %c0_69 = arith.constant 0 : index
    %c0_70 = arith.constant 0 : index
    %87 = vector.load %arg10[%c0_68, %c0_69, %c0_70] : memref<1x1x128xf32, #tpu.memory_space<vmem>>, vector<1x1x128xf32>
    %88 = vector.shape_cast %87 : vector<1x1x128xf32> to vector<1x128xf32>
    %89 = vector.broadcast %88 : vector<1x128xf32> to vector<8x128xf32>
    %90 = arith.addf %86, %89 : vector<8x128xf32>
    %c0_71 = arith.constant 0 : index
    %91 = arith.index_cast %1 : i32 to index
    %c0_72 = arith.constant 0 : index
    %92 = vector.load %arg2[%c0_71, %91, %c0_72] : memref<1x16x128xf32, #tpu.memory_space<vmem>>, vector<1x8x128xf32>
    %93 = vector.shape_cast %92 : vector<1x8x128xf32> to vector<8x128xf32>
    %94 = arith.addf %90, %93 : vector<8x128xf32>
    %c0_73 = arith.constant 0 : index
    %c0_74 = arith.constant 0 : index
    %c0_75 = arith.constant 0 : index
    %95 = vector.load %arg11[%c0_73, %c0_74, %c0_75] : memref<1x8x128xf32, #tpu.memory_space<vmem>>, vector<1x8x128xf32>
    %96 = vector.shape_cast %95 : vector<1x8x128xf32> to vector<8x128xf32>
    %97 = vector.shape_cast %94 : vector<8x128xf32> to vector<1x8x128xf32>
    tpu.vector_store %arg11[%c0_73, %c0_74, %c0_75], %97 {strides = array<i32>} : memref<1x8x128xf32, #tpu.memory_space<vmem>>, vector<1x8x128xf32>,
    return
  }
  func.func @transform_0(%arg0: i32, %arg1: i32) -> (i32, i32, i32) {
    %c0_i32 = arith.constant 0 : i32
    %c0_i32_0 = arith.constant 0 : i32
    %c0_i32_1 = arith.constant 0 : i32
    return %arg0, %c0_i32, %c0_i32_0 : i32, i32, i32
  }
  func.func @transform_1(%arg0: i32, %arg1: i32) -> (i32, i32, i32) {
    %c0_i32 = arith.constant 0 : i32
    %c0_i32_0 = arith.constant 0 : i32
    %c0_i32_1 = arith.constant 0 : i32
    %c0_i32_2 = arith.constant 0 : i32
    return %c0_i32, %c0_i32_0, %c0_i32_1 : i32, i32, i32
  }
  func.func @transform_2(%arg0: i32, %arg1: i32) -> (i32, i32, i32) {
    %c0_i32 = arith.constant 0 : i32
    %c0_i32_0 = arith.constant 0 : i32
    %c0_i32_1 = arith.constant 0 : i32
    return %arg0, %c0_i32, %c0_i32_0 : i32, i32, i32
  }
  func.func @transform_3(%arg0: i32, %arg1: i32) -> (i32, i32, i32) {
    %c0_i32 = arith.constant 0 : i32
    %c0_i32_0 = arith.constant 0 : i32
    %c0_i32_1 = arith.constant 0 : i32
    %c0_i32_2 = arith.constant 0 : i32
    return %c0_i32, %c0_i32_0, %c0_i32_1 : i32, i32, i32
  }
  func.func @transform_4(%arg0: i32, %arg1: i32) -> (i32, i32, i32) {
    %c0_i32 = arith.constant 0 : i32
    %c0_i32_0 = arith.constant 0 : i32
    %c0_i32_1 = arith.constant 0 : i32
    %c0_i32_2 = arith.constant 0 : i32
    return %c0_i32, %c0_i32_0, %c0_i32_1 : i32, i32, i32
  }
  func.func @transform_5(%arg0: i32, %arg1: i32) -> (i32, i32, i32) {
    %c0_i32 = arith.constant 0 : i32
    %c0_i32_0 = arith.constant 0 : i32
    %c0_i32_1 = arith.constant 0 : i32
    %c0_i32_2 = arith.constant 0 : i32
    return %c0_i32, %c0_i32_0, %c0_i32_1 : i32, i32, i32
  }
  func.func @transform_6(%arg0: i32, %arg1: i32) -> (i32, i32, i32) {
    %c0_i32 = arith.constant 0 : i32
    %c0_i32_0 = arith.constant 0 : i32
    %c0_i32_1 = arith.constant 0 : i32
    return %arg0, %c0_i32, %c0_i32_0 : i32, i32, i32
  }
  func.func @transform_7(%arg0: i32, %arg1: i32) -> (i32, i32, i32) {
    %c0_i32 = arith.constant 0 : i32
    %c0_i32_0 = arith.constant 0 : i32
    %c0_i32_1 = arith.constant 0 : i32
    %c0_i32_2 = arith.constant 0 : i32
    return %c0_i32, %c0_i32_0, %c0_i32_1 : i32, i32, i32
  }
  func.func @transform_8(%arg0: i32, %arg1: i32) -> (i32, i32, i32) {
    %c0_i32 = arith.constant 0 : i32
    %c0_i32_0 = arith.constant 0 : i32
    %c0_i32_1 = arith.constant 0 : i32
    %c0_i32_2 = arith.constant 0 : i32
    return %c0_i32, %c0_i32_0, %c0_i32_1 : i32, i32, i32
  }
  func.func @transform_9(%arg0: i32, %arg1: i32) -> (i32, i32, i32) {
    %c0_i32 = arith.constant 0 : i32
    %c0_i32_0 = arith.constant 0 : i32
    return %arg0, %arg1, %c0_i32 : i32, i32, i32
  }
}

</mosaic_0001>

<bundles_post_ra>
// kernel: resup_forward.3
= control target key start
LH: loop header
LB: loop body
LE: loop exit
PB: predicated region body
PF: predicated region fallthrough
CT: control target
= control target key end

     0   :  { %s1428_s17 = smov 0   ;;  %s1430_s18 = smov 0   ;;  %s1606_s0 = inlined_call_operand.vmem [shape: f32[2,16,64], index: 0, kind: input, shape index: {}]   ;;  %s1607_s1 = inlined_call_operand.vmem [shape: f32[2,16,128], index: 1, kind: input, shape index: {}]   ;;  %s1608_s2 = inlined_call_operand.vmem [shape: f32[1,1,64], index: 2, kind: input, shape index: {}]   ;;  %s1609_s3 = inlined_call_operand.vmem [shape: f32[1,1,64], index: 3, kind: input, shape index: {}]   ;;  %s1610_s4 = inlined_call_operand.vmem [shape: bf16[3,64,128], index: 4, kind: input, shape index: {}]   ;;  %s1611_s5 = inlined_call_operand.vmem [shape: f32[1,1,128], index: 5, kind: input, shape index: {}]   ;;  %s1612_s6 = inlined_call_operand.vmem [shape: f32[1,1,64], index: 6, kind: input, shape index: {}]   ;;  %s1613_s7 = inlined_call_operand.vmem [shape: f32[1,1,64], index: 7, kind: input, shape index: {}]   ;;  %s1614_s8 = inlined_call_operand.vmem [shape: bf16[1,64,128], index: 8, kind: input, shape index: {}]   ;;  %s1615_s9 = inlined_call_operand.vmem [shape: f32[1,1,128], index: 9, kind: input, shape index: {}]   ;;  %s1616_s10 = inlined_call_operand.vmem [shape: f32[2,16,128], index: 10, kind: output, shape index: {0}]   ;;  %s1617_s11 = inlined_call_operand.vmem [shape: f32[2,16,128], index: 11, kind: output, shape index: {1}]  }
   0x1   :  { %1618 = sst [smem:[#allocation3_spill]] %s1606_s0  ;;  %s1432_s19 = smov 0  }
   0x2   :  { %s1434_s20 = smov 0   ;;  %s1436_s21 = smov 0  }
   0x3 LB: > { %s31_s22 = sadd.s32 1, %s1356_s19  ;;  %s34_s23 = sadd.s32 1, %s1360_s20  ;;  %s1364_s21 = sphi %s1436_s21, %s22_s21   ;;  %s1360_s20 = sphi %s1434_s20, %s1623_s20   ;;  %s1356_s19 = sphi %s1432_s19, %s1622_s19   ;;  %s1352_s18 = sphi %s1430_s18, %s1621_s18   ;;  %s1348_s17 = sphi %s1428_s17, %s1620_s17  }
   0x4   : > { %p32_p0 = scmp.ge.s32.totalorder %s31_s22, 2  ;;  %p1112_p1 = scmp.ge.s32.totalorder %s1364_s21, 1 }
   0x5   : > { %p371_p2 = scmp.lt.s32.totalorder %s1364_s21, 5 }
   0x6   : > { %s1625_s22 = smov (%p32_p0, %s31_s22), 0  ;;  %s1627_s23 = smov (!%p32_p0, %s34_s23), %s1360_s20 }
   0x7   : > { %p372_p3 = pnand %p1112_p1, %p371_p2  ;;  %p36_p4 = scmp.ge.s32.totalorder %s1627_s23, 2 }
   0x8   : > { %p430_p5 = scmp.lt.s32.totalorder (!%p372_p3), %s1352_s18, 1  ;;  %v463_v0 = vlaneseq (!%p372_p3)  ;;  %v1366_v1 = vmov (!%p372_p3), 0.0   ;;  %v1127_v2 = vld [vmem:[%s1608_s2] ss:$0 sm:$0xff] (!%p372_p3)  ;;  %vm1367_vm0 = vmmov (!%p372_p3), 0   ;;  %s1619_s0 = sld [smem:[#allocation3_spill]] (!%p372_p3) }
   0x9   : > { %s1629_s23 = smov (%p36_p4, %s1627_s23), 0  ;;  %375 = sbr.rel (%p372_p3) target bundleno = 488 (0x1e8), region = 60 }
   0xa   : > { %1198 = vmatprep.subr.bf16.mxu0 (!%p372_p3), %v1366_v1  ;;  %1204 = vmatprep.subr.bf16.mxu1 (!%p372_p3), %v1366_v1  ;;  %v464_v3 = vshrl.u32 (!%p372_p3), %v463_v0, 7  ;;  %v467_v4 = vand.u32 (!%p372_p3), 127, %v463_v0  ;;  %v1128_v5 = vld [vmem:[%s1609_s3] ss:$0 sm:$0xff] (!%p372_p3)  ;;  %vm505_vm5 = vcmask (!%p372_p3), 130048   ;;  %v1311_v26 = vld [vmem:[%s1610_s4 + $0x28] sm:$0xff] (!%p372_p3)  }
   0xb   : > { %1200 = vmatprep.mubr.msk.bf16.mxu0 (!%p372_p3), %vm1367_vm0, %v1366_v1  ;;  %1206 = vmatprep.mubr.msk.bf16.mxu1 (!%p372_p3), %vm1367_vm0, %v1366_v1  ;;  %v1310_v22 = vld [vmem:[%s1610_s4 + $0x20] sm:$0xff] (!%p372_p3)   ;;  %v1316_v27 = vld [vmem:[%s1610_s4 + $0x8] sm:$0xff] (!%p372_p3)   ;;  %v1312_v28 = vld [vmem:[%s1610_s4 + $0x30] sm:$0xff] (!%p372_p3)   ;;  %vm628_vm6 = vcmask (!%p372_p3), 523264   ;;  %p437_p6 = scmp.lt.s32.totalorder (!%p372_p3), %s1348_s17, 1  ;;  %s1121_s24 = sshll.u32 (!%p372_p3), %s1348_s17, 3 }
   0xc   : > { %v465_v6 = vadd.s32 (!%p372_p3), 8, %v464_v3  ;;  %v468_v7 = vadd.s32 (!%p372_p3), 1, %v467_v4  ;;  %v1124_v8 = vadd.s32 (!%p372_p3), 4294967295, %v467_v4  ;;  %v1314_v23 = vld [vmem:[%s1610_s4] sm:$0xff] (!%p372_p3)   ;;  %v1318_v29 = vld [vmem:[%s1610_s4 + $0x10] sm:$0xff] (!%p372_p3)   ;;  %v1313_v30 = vld [vmem:[%s1610_s4 + $0x38] sm:$0xff] (!%p372_p3)  }
   0xd   : > { %v1315_v31 = vld [vmem:[%s1610_s4 + $0x40] sm:$0xff] (!%p372_p3)   ;;  %v1317_v32 = vld [vmem:[%s1610_s4 + $0x48] sm:$0xff] (!%p372_p3)   ;;  %v1319_v33 = vld [vmem:[%s1610_s4 + $0x50] sm:$0xff] (!%p372_p3)  }
   0xe   : > { %vm469_vm1 = vcmp.eq.s32.totalorder (!%p372_p3), %v464_v3, %v468_v7  ;;  %vm470_vm2 = vcmp.eq.s32.totalorder (!%p372_p3), %v465_v6, %v468_v7  ;;  %vm477_vm3 = vcmp.eq.s32.totalorder (!%p372_p3), %v464_v3, %v1124_v8  ;;  %vm478_vm4 = vcmp.eq.s32.totalorder (!%p372_p3), %v465_v6, %v1124_v8  ;;  %v1320_v34 = vld [vmem:[%s1610_s4 + $0x18] sm:$0xff] (!%p372_p3)   ;;  %v1163_v36 = vld [vmem:[%s1612_s6] ss:$0 sm:$0xff] (!%p372_p3)  ;;  %v1323_v54 = vld [vmem:[%s1614_s8 + $0x8] sm:$0xff] (!%p372_p3)  }
   0xf   : > { %v1122_v15 = vsel (!%p372_p3), %vm469_vm1, 1.0, %v1366_v1  ;;  %v1123_v16 = vsel (!%p372_p3), %vm470_vm2, 1.0, %v1366_v1  ;;  %v1125_v19 = vsel (!%p372_p3), %vm477_vm3, 1.0, %v1366_v1  ;;  %v1126_v20 = vsel (!%p372_p3), %vm478_vm4, 1.0, %v1366_v1  ;;  %v1321_v35 = vld [vmem:[%s1610_s4 + $0x58] sm:$0xff] (!%p372_p3)   ;;  %v1322_v49 = vld [vmem:[%s1614_s8] sm:$0xff] (!%p372_p3)  }
  0x10   : > { %s1631_s18 = smov (!%p430_p5, %s1352_s18), 1  ;;  %v475_v24 = vpack.c.bf16 %v1123_v16, %v1122_v15  ;;  %v483_v25 = vpack.c.bf16 %v1126_v20, %v1125_v19  ;;  %v1164_v39 = vld [vmem:[%s1613_s7] ss:$0 sm:$0xff]  ;;  %v1324_v55 = vld [vmem:[%s1614_s8 + $0x10] sm:$0xff]   ;;  %v1325_v56 = vld [vmem:[%s1614_s8 + $0x18] sm:$0xff]  }
  0x11   : > { %s1173_s26 = sshll.u32 %s1631_s18, 4  ;;  %s1115_s14 = sshll.u32 %s1631_s18, 1 }
  0x12   : > { %s434_s12 = scalar_lea.vmem %s1619_s0, %s1173_s26  ;;  %s841_s18 = scalar_lea.vmem [#allocation2], %s1121_s24 }
  0x13   : > { %v1478_v9 = vld [vmem:[%s434_s12] sm:$0xff]  ;;  %v1480_v10 = vld [vmem:[%s434_s12 + $0x8] sm:$0xff]  ;;  %s438_s13 = scalar_select %p437_p6, %s1348_s17, 1 }
  0x14   : > { %v491_v11 = vmul.f32 %v1127_v2, %v1478_v9  ;;  %v492_v12 = vmul.f32 %v1127_v2, %v1480_v10  ;;  %v861_v37 = vmul.f32 %v1163_v36, %v1478_v9  ;;  %v862_v38 = vmul.f32 %v1163_v36, %v1480_v10 }
  0x15   : > { %s440_s15 = sadd.s32 %s1115_s14, %s438_s13 }
  0x16   : > { %v500_v13 = vadd.f32 %v1128_v5, %v491_v11  ;;  %v501_v14 = vadd.f32 %v1128_v5, %v492_v12  ;;  %v870_v40 = vadd.f32 %v1164_v39, %v861_v37  ;;  %v871_v41 = vadd.f32 %v1164_v39, %v862_v38  ;;  %s1116_s16 = sshll.u32 %s440_s15, 3  ;;  %v1170_v12 = vld [vmem:[%s1615_s9] ss:$0 sm:$0xff] }
  0x17   : > { %s442_s27 = scalar_lea.vmem %s1607_s1, %s1116_s16  ;;  %s450_s0 = scalar_lea.vmem %s1616_s10, %s1116_s16 }
  0x18   : > { %v502_v17 = vmax.f32 %v500_v13, 0.0  ;;  %v503_v18 = vmax.f32 %v501_v14, 0.0  ;;  %v872_v42 = vpack.c.bf16 %v871_v41, %v870_v40  ;;  %v851_v5 = vld [vmem:[%s442_s27] sm:$0xff]  ;;  %s458_s24 = scalar_lea.vmem %s1617_s11, %s1116_s16 }
  0x1a   : > { %v504_v21 = vpack.c.bf16 %v503_v18, %v502_v17 }
  0x1c   : > { %1199 = vmatpush3.bf16.msra.mxu0 %v504_v21  ;;  %1205 = vmatpush3.bf16.msra.mxu1 %v504_v21 }
  0x1d   : > { %1222 = vmatprep.subr.bf16.mxu0 %v1366_v1  ;;  %1210 = vmatprep.subr.bf16.mxu1 %v1366_v1 }
  0x1f   : > { %1201 = vmatmul.mubr.msk.bf16.vlgmr.msra.gmra.mrb[0].mxu0 %vm505_vm5, %v475_v24  ;;  %1207 = vmatmul.mubr.msk.bf16.vlgmr.msra.gmra.mrb[0].mxu1 %vm505_vm5, %v483_v25 }
  0x20   : > { %1223 = vmatpush3.bf16.msra.mxu0 %v1310_v22  ;;  %1211 = vmatpush3.bf16.msra.mxu1 %v1314_v23 }
  0x21   : > { %1224 = vmatprep.subr.bf16.mxu0 %v1366_v1  ;;  %1230 = vmatprep.mubr.msk.bf16.mxu0 %vm1367_vm0, %v1366_v1 }
  0x22   : > { %1212 = vmatprep.subr.bf16.mxu1 %v1366_v1  ;;  %1218 = vmatprep.mubr.msk.bf16.mxu1 %vm1367_vm0, %v1366_v1 }
  0x24   : > { %1225 = vmatpush3.bf16.msra.mxu0 %v1311_v26  ;;  %1213 = vmatpush3.bf16.msra.mxu1 %v1316_v27 }
  0x25   : > { %1226 = vmatprep.subr.bf16.mxu0 %v1366_v1  ;;  %1214 = vmatprep.subr.bf16.mxu1 %v1366_v1 }
  0x28   : > { %1227 = vmatpush3.bf16.msra.mxu0 %v1312_v28  ;;  %1215 = vmatpush3.bf16.msra.mxu1 %v1318_v29 }
  0x29   : > { %1228 = vmatprep.subr.bf16.mxu0 %v1366_v1  ;;  %1216 = vmatprep.subr.bf16.mxu1 %v1366_v1 }
  0x2c   : > { %1229 = vmatpush3.bf16.msra.mxu0 %v1313_v30  ;;  %1217 = vmatpush3.bf16.msra.mxu1 %v1320_v34 }
  0x2d   : > { %1234 = vmatprep.subr.bf16.mxu0 %v1366_v1  ;;  %1246 = vmatprep.subr.bf16.mxu1 %v1366_v1 }
  0x2f   : > { %1231 = vmatmul.mubr.msk.bf16.vlgmr.msra.gmra.mrb[4].mxu0 %vm628_vm6, %v504_v21 }
  0x30   : > { %1235 = vmatpush3.bf16.msra.mxu0 %v1315_v31  ;;  %1242 = vmatprep.mubr.msk.bf16.mxu0 %vm1367_vm0, %v1366_v1 }
  0x31   : > { %1236 = vmatprep.subr.bf16.mxu0 %v1366_v1 }
  0x34   : > { %1237 = vmatpush3.bf16.msra.mxu0 %v1317_v32 }
  0x35   : > { %1238 = vmatprep.subr.bf16.mxu0 %v1366_v1 }
  0x38   : > { %1239 = vmatpush3.bf16.msra.mxu0 %v1319_v33 }
  0x39   : > { %1240 = vmatprep.subr.bf16.mxu0 %v1366_v1 }
  0x3c   : > { %1241 = vmatpush3.bf16.msra.mxu0 %v1321_v35 }
  0xf2   : > { %v543_v43 = vpop.f32.mrb[0].mxu0  ;;  %v588_v44 = vpop.f32.mrb[0].mxu1 }
  0xf3   : > { %v1202_v45 = vpop.f32.mrb[1].mxu0  ;;  %v1208_v46 = vpop.f32.mrb[1].mxu1 }
  0xf4   : > { %v546_v47 = vpop.f32.mrb[2].mxu0  ;;  %v591_v48 = vpop.f32.mrb[2].mxu1 }
  0xf5   : > { %v550_v50 = vpack.c.bf16 %v546_v47, %v543_v43  ;;  %v595_v51 = vpack.c.bf16 %v591_v48, %v588_v44  ;;  %v1203_v52 = vpop.f32.mrb[3].mxu0  ;;  %v1209_v53 = vpop.f32.mrb[3].mxu1 }
  0xf7   : > { %1219 = vmatmul.mubr.msk.bf16.vlgmr.msra.gmra.mrb[4].mxu1 %vm628_vm6, %v550_v50  ;;  %1243 = vmatmul.mubr.msk.bf16.vlgmr.msra.gmra.mrb[4].mxu0 %vm628_vm6, %v595_v51 }
  0xf8   : > { %1247 = vmatpush3.bf16.msra.mxu1 %v1322_v49  ;;  %1254 = vmatprep.mubr.msk.bf16.mxu1 %vm1367_vm0, %v1366_v1 }
  0xf9   : > { %1248 = vmatprep.subr.bf16.mxu1 %v1366_v1 }
  0xfc   : > { %1249 = vmatpush3.bf16.msra.mxu1 %v1323_v54 }
  0xfd   : > { %1250 = vmatprep.subr.bf16.mxu1 %v1366_v1 }
 0x100   : > { %1251 = vmatpush3.bf16.msra.mxu1 %v1324_v55 }
 0x101   : > { %1252 = vmatprep.subr.bf16.mxu1 %v1366_v1  ;;  %v1162_v1 = vld [vmem:[%s1611_s5] ss:$0 sm:$0xff] }
 0x104   : > { %1253 = vmatpush3.bf16.msra.mxu1 %v1325_v56 }
 0x107   : > { %1255 = vmatmul.mubr.msk.bf16.vlgmr.msra.gmra.mrb[8].mxu1 %vm628_vm6, %v872_v42 }
 0x1ca   : > { %v666_v57 = vpop.f32.mrb[4].mxu1  ;;  %v830_v58 = vpop.f32.mrb[4].mxu0 }
 0x1cb   : > { %v1260_v59 = vadd.f32 %v830_v58, %v666_v57  ;;  %v1220_v60 = vpop.f32.mrb[5].mxu1  ;;  %v1244_v61 = vpop.f32.mrb[5].mxu0 }
 0x1cc   : > { %v669_v62 = vpop.f32.mrb[6].mxu1  ;;  %v833_v63 = vpop.f32.mrb[6].mxu0 }
 0x1cd   : > { %839 = vst [vmem:[#allocation2] sm:$0xff] %v1260_v59  ;;  %v1263_v0 = vadd.f32 %v833_v63, %v669_v62  ;;  %v1221_v2 = vpop.f32.mrb[7].mxu1  ;;  %v1245_v3 = vpop.f32.mrb[7].mxu0 }
 0x1cf   : > { %840 = vst [vmem:[#allocation2 + $0x8] sm:$0xff] %v1263_v0 }
 0x1d6   : > { %v842_v4 = vld [vmem:[%s841_s18] sm:$0xff] }
 0x1d7   : > { %v850_v6 = vadd.f32 %v1162_v1, %v842_v4 }
 0x1d9   : > { %v852_v7 = vadd.f32 %v851_v5, %v850_v6 }
 0x1da   : > { %v942_v8 = vpop.f32.mrb[8].mxu1 }
 0x1db   : > { %853 = vst [vmem:[%s450_s0] sm:$0xff] %v852_v7  ;;  %949 = vst [vmem:[#allocation2] sm:$0xff] %v942_v8  ;;  %v1256_v9 = vpop.f32.mrb[9].mxu1 }
 0x1dc   : > { %v945_v10 = vpop.f32.mrb[10].mxu1 }
 0x1dd   : > { %950 = vst [vmem:[#allocation2 + $0x8] sm:$0xff] %v945_v10  ;;  %v1257_v11 = vpop.f32.mrb[11].mxu1 }
 0x1e4   : > { %v951_v13 = vld [vmem:[%s841_s18] sm:$0xff] }
 0x1e5   : > { %v959_v14 = vadd.f32 %v1170_v12, %v951_v13 }
 0x1e7   : > { %960 = vst [vmem:[%s458_s24] sm:$0xff] %v959_v14 }
 0x1e8 PF: > { %s22_s21 = sadd.s32 1, %s1364_s21   ;;  %s1620_s17 = smov %s1356_s19 }
 0x1e9   : > { %p19_p7 = scmp.ge.s32.totalorder %s22_s21, 6   ;;  %s1621_s18 = smov %s1360_s20 }
 0x1ea   : > { %s1622_s19 = smov %s1625_s22  ;;  %s1623_s20 = smov %s1629_s23 }
 0x1eb   :  { %21 = sbr.rel (!%p19_p7) target bundleno = 3 (0x3), region = 108 }

// kernel: resup_forward.4
= control target key start
LH: loop header
LB: loop body
LE: loop exit
PB: predicated region body
PF: predicated region fallthrough
CT: control target
= control target key end

     0   :  { %s1244_s21 = smov 0   ;;  %s1246_s22 = smov 0   ;;  %s1431_s0 = inlined_call_operand.vmem [shape: f32[2,16,128], index: 0, kind: input, shape index: {}]   ;;  %s1432_s1 = inlined_call_operand.vmem [shape: f32[2,16,128], index: 1, kind: input, shape index: {}]   ;;  %s1433_s2 = inlined_call_operand.vmem [shape: f32[1,1,128], index: 2, kind: input, shape index: {}]   ;;  %s1434_s3 = inlined_call_operand.vmem [shape: f32[2,1,128], index: 3, kind: input, shape index: {}]   ;;  %s1435_s4 = inlined_call_operand.vmem [shape: bf16[3,128,128], index: 4, kind: input, shape index: {}]   ;;  %s1436_s5 = inlined_call_operand.vmem [shape: f32[1,1,128], index: 5, kind: input, shape index: {}]   ;;  %s1437_s6 = inlined_call_operand.vmem [shape: f32[2,16,128], index: 6, kind: output, shape index: {}]  }
   0x1   :  { %s1248_s23 = smov 0   ;;  %s1250_s24 = smov 0  }
   0x2   :  { %s1252_s25 = smov 0  }
   0x3 LB: > { %s25_s26 = sadd.s32 1, %s1197_s23  ;;  %s28_s27 = sadd.s32 1, %s1201_s24  ;;  %s1205_s25 = sphi %s1252_s25, %s16_s25   ;;  %s1201_s24 = sphi %s1250_s24, %s1441_s24   ;;  %s1197_s23 = sphi %s1248_s23, %s1440_s23   ;;  %s1193_s22 = sphi %s1246_s22, %s1439_s22   ;;  %s1189_s21 = sphi %s1244_s21, %s1438_s21  }
   0x4   : > { %p26_p0 = scmp.ge.s32.totalorder %s25_s26, 2  ;;  %p911_p1 = scmp.ge.s32.totalorder %s1205_s25, 1 }
   0x5   : > { %p249_p2 = scmp.lt.s32.totalorder %s1205_s25, 5 }
   0x6   : > { %s1443_s26 = smov (%p26_p0, %s25_s26), 0  ;;  %s1445_s27 = smov (!%p26_p0, %s28_s27), %s1201_s24 }
   0x7   : > { %p250_p3 = pnand %p911_p1, %p249_p2  ;;  %p30_p4 = scmp.ge.s32.totalorder %s1445_s27, 2 }
   0x8   : > { %p293_p5 = scmp.lt.s32.totalorder (!%p250_p3), %s1193_s22, 1  ;;  %v321_v0 = vlaneseq (!%p250_p3)  ;;  %v1207_v1 = vmov (!%p250_p3), 0.0   ;;  %vm1208_vm0 = vmmov (!%p250_p3), 0   ;;  %v1143_v2 = vld [vmem:[%s1435_s4 + $0x40] sm:$0xff] (!%p250_p3)   ;;  %v1144_v5 = vld [vmem:[%s1435_s4 + $0x48] sm:$0xff] (!%p250_p3)   ;;  %v1145_v14 = vld [vmem:[%s1435_s4 + $0x50] sm:$0xff] (!%p250_p3)  }
   0x9   : > { %s1447_s27 = smov (%p30_p4, %s1445_s27), 0  ;;  %253 = sbr.rel (%p250_p3) target bundleno = 484 (0x1e4), region = 44 }
   0xa   : > { %1019 = vmatprep.subr.bf16.mxu1 (!%p250_p3), %v1207_v1  ;;  %1021 = vmatprep.mubr.msk.bf16.mxu1 (!%p250_p3), %vm1208_vm0, %v1207_v1  ;;  %v322_v3 = vshrl.u32 (!%p250_p3), %v321_v0, 7  ;;  %v325_v4 = vand.u32 (!%p250_p3), 127, %v321_v0  ;;  %v924_v6 = vld [vmem:[%s1433_s2] ss:$0 sm:$0xff] (!%p250_p3)  ;;  %v1146_v18 = vld [vmem:[%s1435_s4 + $0x58] sm:$0xff] (!%p250_p3)   ;;  %vm363_vm3 = vcmask (!%p250_p3), 130048  }
   0xb   : > { %1051 = vmatprep.subr.bf16.mxu0 (!%p250_p3), %v1207_v1  ;;  %1067 = vmatprep.mubr.msk.bf16.mxu0 (!%p250_p3), %vm1208_vm0, %v1207_v1  ;;  %v1147_v25 = vld [vmem:[%s1435_s4 + $0x60] sm:$0xff] (!%p250_p3)   ;;  %v1148_v28 = vld [vmem:[%s1435_s4 + $0x68] sm:$0xff] (!%p250_p3)   ;;  %v1150_v31 = vld [vmem:[%s1435_s4 + $0x70] sm:$0xff] (!%p250_p3)   ;;  %p300_p6 = scmp.lt.s32.totalorder (!%p250_p3), %s1189_s21, 1  ;;  %s918_s14 = sshll.u32 (!%p250_p3), %s1189_s21, 3 }
   0xc   : > { %1052 = vmatpush3.bf16.msra.mxu0 (!%p250_p3), %v1143_v2  ;;  %v323_v7 = vadd.s32 (!%p250_p3), 8, %v322_v3  ;;  %v326_v8 = vadd.s32 (!%p250_p3), 1, %v325_v4  ;;  %v921_v17 = vadd.s32 (!%p250_p3), 4294967295, %v325_v4  ;;  %v1149_v30 = vld [vmem:[%s1435_s4] sm:$0xff] (!%p250_p3)   ;;  %v1151_v32 = vld [vmem:[%s1435_s4 + $0x8] sm:$0xff] (!%p250_p3)   ;;  %v1152_v33 = vld [vmem:[%s1435_s4 + $0x78] sm:$0xff] (!%p250_p3)  }
   0xd   : > { %1053 = vmatprep.subr.bf16.mxu0 (!%p250_p3), %v1207_v1  ;;  %v1153_v34 = vld [vmem:[%s1435_s4 + $0x10] sm:$0xff] (!%p250_p3)   ;;  %v1154_v35 = vld [vmem:[%s1435_s4 + $0x80] sm:$0xff] (!%p250_p3)   ;;  %v1155_v36 = vld [vmem:[%s1435_s4 + $0x18] sm:$0xff] (!%p250_p3)  }
   0xe   : > { %vm327_vm1 = vcmp.eq.s32.totalorder (!%p250_p3), %v322_v3, %v326_v8  ;;  %vm328_vm2 = vcmp.eq.s32.totalorder (!%p250_p3), %v323_v7, %v326_v8  ;;  %vm336_vm4 = vcmp.eq.s32.totalorder (!%p250_p3), %v323_v7, %v921_v17  ;;  %vm335_vm5 = vcmp.eq.s32.totalorder (!%p250_p3), %v322_v3, %v921_v17  ;;  %v1156_v37 = vld [vmem:[%s1435_s4 + $0x88] sm:$0xff] (!%p250_p3)   ;;  %v1157_v38 = vld [vmem:[%s1435_s4 + $0x20] sm:$0xff] (!%p250_p3)   ;;  %v1158_v39 = vld [vmem:[%s1435_s4 + $0x90] sm:$0xff] (!%p250_p3)  }
   0xf   : > { %v919_v21 = vsel (!%p250_p3), %vm327_vm1, 1.0, %v1207_v1  ;;  %v920_v22 = vsel (!%p250_p3), %vm328_vm2, 1.0, %v1207_v1  ;;  %v922_v26 = vsel (!%p250_p3), %vm335_vm5, 1.0, %v1207_v1  ;;  %v923_v27 = vsel (!%p250_p3), %vm336_vm4, 1.0, %v1207_v1  ;;  %v1159_v40 = vld [vmem:[%s1435_s4 + $0x28] sm:$0xff] (!%p250_p3)   ;;  %v1160_v41 = vld [vmem:[%s1435_s4 + $0x98] sm:$0xff] (!%p250_p3)  }
  0x10   : > { %s1449_s22 = smov (!%p293_p5, %s1193_s22), 1  ;;  %1054 = vmatpush3.bf16.msra.mxu0 %v1144_v5  ;;  %v333_v24 = vpack.c.bf16 %v920_v22, %v919_v21  ;;  %v341_v29 = vpack.c.bf16 %v923_v27, %v922_v26  ;;  %v1161_v42 = vld [vmem:[%s1435_s4 + $0x30] sm:$0xff]   ;;  %v1162_v43 = vld [vmem:[%s1435_s4 + $0xa0] sm:$0xff]   ;;  %v1163_v44 = vld [vmem:[%s1435_s4 + $0x38] sm:$0xff]  }
  0x11   : > { %s987_s8 = sshll.u32 %s1449_s22, 4  ;;  %s308_s16 = scalar_lea.vmem %s1434_s3, %s1449_s22  ;;  %1055 = vmatprep.subr.bf16.mxu0 %v1207_v1  ;;  %v1164_v45 = vld [vmem:[%s1435_s4 + $0xa8] sm:$0xff]   ;;  %v1165_v46 = vld [vmem:[%s1435_s4 + $0xb0] sm:$0xff]   ;;  %v1166_v47 = vld [vmem:[%s1435_s4 + $0xb8] sm:$0xff]  }
  0x12   : > { %s297_s13 = scalar_lea.vmem %s1431_s0, %s987_s8  ;;  %v925_v13 = vld [vmem:[%s308_s16] ss:$0 sm:$0xff]  ;;  %s914_s11 = sshll.u32 %s1449_s22, 1 }
  0x13   : > { %v319_v9 = vld [vmem:[%s297_s13] sm:$0xff]  ;;  %v320_v10 = vld [vmem:[%s297_s13 + $0x8] sm:$0xff]  ;;  %s301_s10 = scalar_select %p300_p6, %s1189_s21, 1 }
  0x14   : > { %v349_v11 = vmul.f32 %v924_v6, %v319_v9  ;;  %v350_v12 = vmul.f32 %v924_v6, %v320_v10  ;;  %1056 = vmatpush3.bf16.msra.mxu0 %v1145_v14  ;;  %v984_v4 = vld [vmem:[%s1436_s5] ss:$0 sm:$0xff]  ;;  %s785_s22 = scalar_lea.vmem [#allocation2], %s918_s14 }
  0x15   : > { %1057 = vmatprep.subr.bf16.mxu0 %v1207_v1  ;;  %s303_s12 = sadd.s32 %s914_s11, %s301_s10 }
  0x16   : > { %v358_v15 = vadd.f32 %v925_v13, %v349_v11  ;;  %v359_v16 = vadd.f32 %v925_v13, %v350_v12  ;;  %s915_s13 = sshll.u32 %s303_s12, 3 }
  0x17   : > { %s305_s17 = scalar_lea.vmem %s1432_s1, %s915_s13  ;;  %s316_s29 = scalar_lea.vmem %s1437_s6, %s915_s13 }
  0x18   : > { %v360_v19 = vmax.f32 %v358_v15, 0.0  ;;  %v361_v20 = vmax.f32 %v359_v16, 0.0  ;;  %1058 = vmatpush3.bf16.msra.mxu0 %v1146_v18  ;;  %v795_v5 = vld [vmem:[%s305_s17] sm:$0xff] }
  0x19   : > { %1059 = vmatprep.subr.bf16.mxu0 %v1207_v1 }
  0x1a   : > { %v362_v23 = vpack.c.bf16 %v361_v20, %v360_v19 }
  0x1c   : > { %1020 = vmatpush3.bf16.msra.mxu1 %v362_v23  ;;  %1060 = vmatpush3.bf16.msra.mxu0 %v1147_v25 }
  0x1d   : > { %1025 = vmatprep.subr.bf16.mxu1 %v1207_v1  ;;  %1061 = vmatprep.subr.bf16.mxu0 %v1207_v1 }
  0x1f   : > { %1022 = vmatmul.mubr.msk.bf16.vlgmr.msra.gmra.mrb[0].mxu1 %vm363_vm3, %v333_v24 }
  0x20   : > { %1026 = vmatpush3.bf16.msra.mxu1 %v362_v23  ;;  %1027 = vmatprep.mubr.msk.bf16.mxu1 %vm1208_vm0, %v1207_v1 }
  0x21   : > { %1031 = vmatprep.subr.bf16.mxu1 %v1207_v1  ;;  %1062 = vmatpush3.bf16.msra.mxu0 %v1148_v28 }
  0x22   : > { %1063 = vmatprep.subr.bf16.mxu0 %v1207_v1 }
  0x25   : > { %1064 = vmatpush3.bf16.msra.mxu0 %v1150_v31 }
  0x26   : > { %1065 = vmatprep.subr.bf16.mxu0 %v1207_v1 }
  0x27   : > { %1028 = vmatmul.mubr.msk.bf16.vlgmr.msra.gmra.mrb[4].mxu1 %vm363_vm3, %v341_v29 }
  0x28   : > { %1032 = vmatpush3.bf16.msra.mxu1 %v1149_v30  ;;  %1047 = vmatprep.mubr.msk.bf16.mxu1 %vm1208_vm0, %v1207_v1 }
  0x29   : > { %1033 = vmatprep.subr.bf16.mxu1 %v1207_v1  ;;  %1066 = vmatpush3.bf16.msra.mxu0 %v1152_v33 }
  0x2a   : > { %1071 = vmatprep.subr.bf16.mxu0 %v1207_v1 }
  0x2c   : > { %1034 = vmatpush3.bf16.msra.mxu1 %v1151_v32  ;;  %1068 = vmatmul.mubr.bf16.vlgmr.msra.gmra.mrb[0].mxu0 %v362_v23 }
  0x2d   : > { %1035 = vmatprep.subr.bf16.mxu1 %v1207_v1  ;;  %1072 = vmatpush3.bf16.msra.mxu0 %v1154_v35 }
  0x2e   : > { %1073 = vmatprep.subr.bf16.mxu0 %v1207_v1  ;;  %1087 = vmatprep.mubr.msk.bf16.mxu0 %vm1208_vm0, %v1207_v1 }
  0x30   : > { %1036 = vmatpush3.bf16.msra.mxu1 %v1153_v34 }
  0x31   : > { %1037 = vmatprep.subr.bf16.mxu1 %v1207_v1  ;;  %1074 = vmatpush3.bf16.msra.mxu0 %v1156_v37 }
  0x32   : > { %1075 = vmatprep.subr.bf16.mxu0 %v1207_v1 }
  0x34   : > { %1038 = vmatpush3.bf16.msra.mxu1 %v1155_v36 }
  0x35   : > { %1039 = vmatprep.subr.bf16.mxu1 %v1207_v1  ;;  %1076 = vmatpush3.bf16.msra.mxu0 %v1158_v39 }
  0x36   : > { %1077 = vmatprep.subr.bf16.mxu0 %v1207_v1 }
  0x38   : > { %1040 = vmatpush3.bf16.msra.mxu1 %v1157_v38 }
  0x39   : > { %1041 = vmatprep.subr.bf16.mxu1 %v1207_v1  ;;  %1078 = vmatpush3.bf16.msra.mxu0 %v1160_v41 }
  0x3a   : > { %1079 = vmatprep.subr.bf16.mxu0 %v1207_v1 }
  0x3c   : > { %1042 = vmatpush3.bf16.msra.mxu1 %v1159_v40 }
  0x3d   : > { %1043 = vmatprep.subr.bf16.mxu1 %v1207_v1  ;;  %1080 = vmatpush3.bf16.msra.mxu0 %v1162_v43 }
  0x3e   : > { %1081 = vmatprep.subr.bf16.mxu0 %v1207_v1 }
  0x40   : > { %1044 = vmatpush3.bf16.msra.mxu1 %v1161_v42 }
  0x41   : > { %1045 = vmatprep.subr.bf16.mxu1 %v1207_v1  ;;  %1082 = vmatpush3.bf16.msra.mxu0 %v1164_v45 }
  0x42   : > { %1083 = vmatprep.subr.bf16.mxu0 %v1207_v1 }
  0x44   : > { %1046 = vmatpush3.bf16.msra.mxu1 %v1163_v44 }
  0x45   : > { %1084 = vmatpush3.bf16.msra.mxu0 %v1165_v46 }
  0x46   : > { %1085 = vmatprep.subr.bf16.mxu0 %v1207_v1 }
  0x49   : > { %1086 = vmatpush3.bf16.msra.mxu0 %v1166_v47 }
  0xf2   : > { %v401_v48 = vpop.f32.mrb[0].mxu1 }
  0xf3   : > { %v1023_v49 = vpop.f32.mrb[1].mxu1 }
  0xf4   : > { %v404_v50 = vpop.f32.mrb[2].mxu1 }
  0xf5   : > { %v408_v51 = vpack.c.bf16 %v404_v50, %v401_v48  ;;  %v1024_v52 = vpop.f32.mrb[3].mxu1 }
  0xf7   : > { %1048 = vmatmul.mubr.bf16.vlgmr.msra.gmra.mrb[8].mxu1 %v408_v51 }
  0xfa   : > { %v446_v53 = vpop.f32.mrb[4].mxu1 }
  0xfb   : > { %v1029_v54 = vpop.f32.mrb[5].mxu1 }
  0xfc   : > { %v449_v55 = vpop.f32.mrb[6].mxu1 }
  0xfd   : > { %v453_v56 = vpack.c.bf16 %v449_v55, %v446_v53  ;;  %v1030_v57 = vpop.f32.mrb[7].mxu1 }
  0xff   : > { %1088 = vmatmul.mubr.bf16.vlgmr.msra.gmra.mrb[0].mxu0 %v453_v56 }
 0x1ca   : > { %v552_v58 = vpop.f32.mrb[8].mxu1 }
 0x1cb   : > { %v1049_v59 = vpop.f32.mrb[9].mxu1 }
 0x1cc   : > { %v555_v60 = vpop.f32.mrb[10].mxu1 }
 0x1cd   : > { %v1050_v61 = vpop.f32.mrb[11].mxu1 }
 0x1d2   : > { %v774_v62 = vpop.f32.mrb[0].mxu0 }
 0x1d3   : > { %v1093_v63 = vadd.f32 %v774_v62, %v552_v58  ;;  %v1089_v0 = vpop.f32.mrb[1].mxu0 }
 0x1d4   : > { %v777_v1 = vpop.f32.mrb[2].mxu0 }
 0x1d5   : > { %783 = vst [vmem:[#allocation2] sm:$0xff] %v1093_v63  ;;  %v1096_v2 = vadd.f32 %v777_v1, %v555_v60  ;;  %v1090_v3 = vpop.f32.mrb[3].mxu0 }
 0x1d7   : > { %784 = vst [vmem:[#allocation2 + $0x8] sm:$0xff] %v1096_v2 }
 0x1de   : > { %v786_v6 = vld [vmem:[%s785_s22] sm:$0xff] }
 0x1df   : > { %v794_v7 = vadd.f32 %v984_v4, %v786_v6 }
 0x1e1   : > { %v796_v8 = vadd.f32 %v795_v5, %v794_v7 }
 0x1e3   : > { %797 = vst [vmem:[%s316_s29] sm:$0xff] %v796_v8 }
 0x1e4 PF: > { %s16_s25 = sadd.s32 1, %s1205_s25   ;;  %s1438_s21 = smov %s1197_s23 }
 0x1e5   : > { %p13_p7 = scmp.ge.s32.totalorder %s16_s25, 6   ;;  %s1439_s22 = smov %s1201_s24 }
 0x1e6   : > { %s1440_s23 = smov %s1443_s26  ;;  %s1441_s24 = smov %s1447_s27 }
 0x1e7   :  { %15 = sbr.rel (!%p13_p7) target bundleno = 3 (0x3), region = 83 }

// kernel: resup_forward.5
= control target key start
LH: loop header
LB: loop body
LE: loop exit
PB: predicated region body
PF: predicated region fallthrough
CT: control target
= control target key end

     0   :  { %s1948_s30 = smov 0   ;;  %s1950_s10 = smov 0   ;;  %s2275_s0 = inlined_call_operand.vmem [shape: f32[2,16,128], index: 0, kind: input, shape index: {}]   ;;  %s2276_s1 = inlined_call_operand.vmem [shape: f32[1,1,128], index: 1, kind: input, shape index: {}]   ;;  %s2277_s2 = inlined_call_operand.vmem [shape: f32[2,1,128], index: 2, kind: input, shape index: {}]   ;;  %s2278_s3 = inlined_call_operand.vmem [shape: bf16[3,128,128], index: 3, kind: input, shape index: {}]   ;;  %s2279_s4 = inlined_call_operand.vmem [shape: f32[1,1,128], index: 4, kind: input, shape index: {}]   ;;  %s2280_s5 = inlined_call_operand.vmem [shape: f32[1,1,128], index: 5, kind: input, shape index: {}]   ;;  %s2281_s6 = inlined_call_operand.vmem [shape: f32[2,1,128], index: 6, kind: input, shape index: {}]   ;;  %s2282_s7 = inlined_call_operand.vmem [shape: bf16[3,128,128], index: 7, kind: input, shape index: {}]   ;;  %s2283_s8 = inlined_call_operand.vmem [shape: f32[1,1,128], index: 8, kind: input, shape index: {}]   ;;  %s2284_s9 = inlined_call_operand.vmem [shape: f32[2,16,128], index: 9, kind: output, shape index: {}]  }
   0x1   :  { %s1952_s11 = smov 0   ;;  %s1954_s12 = smov 0  }
   0x2   :  { %s1956_s13 = smov 0  }
   0x3 LB: > { %s28_s14 = sadd.s32 1, %s1886_s11  ;;  %s31_s15 = sadd.s32 1, %s1890_s12  ;;  %s1894_s13 = sphi %s1956_s13, %s19_s13   ;;  %s1890_s12 = sphi %s1954_s12, %s2288_s12   ;;  %s1886_s11 = sphi %s1952_s11, %s2287_s11   ;;  %s1882_s10 = sphi %s1950_s10, %s2286_s10   ;;  %s1878_s30 = sphi %s1948_s30, %s2285_s30  }
   0x4   : > { %p29_p0 = scmp.ge.s32.totalorder %s28_s14, 2  ;;  %p1416_p1 = scmp.ge.s32.totalorder %s1894_s13, 1 }
   0x5   : > { %p317_p2 = scmp.lt.s32.totalorder %s1894_s13, 5 }
   0x6   : > { %s2290_s14 = smov (%p29_p0, %s28_s14), 0  ;;  %s2292_s15 = smov (!%p29_p0, %s31_s15), %s1890_s12 }
   0x7   : > { %p318_p3 = pnand %p1416_p1, %p317_p2  ;;  %p33_p4 = scmp.ge.s32.totalorder %s2292_s15, 2 }
   0x8   : > { %p362_p5 = scmp.lt.s32.totalorder (!%p318_p3), %s1882_s10, 1  ;;  %v385_v0 = vlaneseq (!%p318_p3)  ;;  %v1896_v1 = vmov (!%p318_p3), 0.0   ;;  %vm1897_vm0 = vmmov (!%p318_p3), 0   ;;  %v1427_v4 = vld [vmem:[%s2276_s1] ss:$0 sm:$0xff] (!%p318_p3)  ;;  %vm427_vm5 = vcmask (!%p318_p3), 130048  }
   0x9   : > { %s2294_s15 = smov (%p33_p4, %s2292_s15), 0  ;;  %321 = sbr.rel (%p318_p3) target bundleno = 1047 (0x417), region = 56 }
   0xa   : > { %1614 = vmatprep.subr.bf16.mxu0 (!%p318_p3), %v1896_v1  ;;  %1616 = vmatprep.mubr.msk.bf16.mxu0 (!%p318_p3), %vm1897_vm0, %v1896_v1  ;;  %v386_v2 = vshrl.u32 (!%p318_p3), %v385_v0, 7  ;;  %v389_v3 = vand.u32 (!%p318_p3), 127, %v385_v0  ;;  %v1808_v23 = vld [vmem:[%s2278_s3] sm:$0xff] (!%p318_p3)   ;;  %v1809_v25 = vld [vmem:[%s2278_s3 + $0x8] sm:$0xff] (!%p318_p3)   ;;  %v1810_v26 = vld [vmem:[%s2278_s3 + $0x10] sm:$0xff] (!%p318_p3)   ;;  %p375_p6 = scmp.lt.s32.totalorder (!%p318_p3), %s1878_s30, 1 }
   0xb   : > { %1686 = vmatprep.subr.bf16.mxu1 (!%p318_p3), %v1896_v1  ;;  %1688 = vmatprep.mubr.msk.bf16.mxu1 (!%p318_p3), %vm1897_vm0, %v1896_v1  ;;  %v1811_v27 = vld [vmem:[%s2278_s3 + $0x18] sm:$0xff] (!%p318_p3)   ;;  %v1812_v28 = vld [vmem:[%s2278_s3 + $0x20] sm:$0xff] (!%p318_p3)   ;;  %v1813_v29 = vld [vmem:[%s2278_s3 + $0x28] sm:$0xff] (!%p318_p3)   ;;  %s1421_s26 = sshll.u32 (!%p318_p3), %s1878_s30, 3 }
   0xc   : > { %v387_v5 = vadd.s32 (!%p318_p3), 8, %v386_v2  ;;  %v390_v6 = vadd.s32 (!%p318_p3), 1, %v389_v3  ;;  %v1424_v7 = vadd.s32 (!%p318_p3), 4294967295, %v389_v3  ;;  %v1814_v30 = vld [vmem:[%s2278_s3 + $0x30] sm:$0xff] (!%p318_p3)   ;;  %v1815_v31 = vld [vmem:[%s2278_s3 + $0x38] sm:$0xff] (!%p318_p3)   ;;  %v1816_v35 = vld [vmem:[%s2278_s3 + $0x40] sm:$0xff] (!%p318_p3)  }
   0xd   : > { %v1817_v38 = vld [vmem:[%s2278_s3 + $0x48] sm:$0xff] (!%p318_p3)   ;;  %v1818_v41 = vld [vmem:[%s2278_s3 + $0x50] sm:$0xff] (!%p318_p3)   ;;  %v1819_v45 = vld [vmem:[%s2278_s3 + $0x58] sm:$0xff] (!%p318_p3)  }
   0xe   : > { %vm391_vm1 = vcmp.eq.s32.totalorder (!%p318_p3), %v386_v2, %v390_v6  ;;  %vm392_vm2 = vcmp.eq.s32.totalorder (!%p318_p3), %v387_v5, %v390_v6  ;;  %vm400_vm3 = vcmp.eq.s32.totalorder (!%p318_p3), %v387_v5, %v1424_v7  ;;  %vm399_vm4 = vcmp.eq.s32.totalorder (!%p318_p3), %v386_v2, %v1424_v7  ;;  %v1820_v46 = vld [vmem:[%s2278_s3 + $0x60] sm:$0xff] (!%p318_p3)   ;;  %v1821_v47 = vld [vmem:[%s2278_s3 + $0x68] sm:$0xff] (!%p318_p3)   ;;  %v1822_v48 = vld [vmem:[%s2278_s3 + $0x70] sm:$0xff] (!%p318_p3)  }
   0xf   : > { %v1422_v15 = vsel (!%p318_p3), %vm391_vm1, 1.0, %v1896_v1  ;;  %v1423_v16 = vsel (!%p318_p3), %vm392_vm2, 1.0, %v1896_v1  ;;  %v1425_v17 = vsel (!%p318_p3), %vm399_vm4, 1.0, %v1896_v1  ;;  %v1426_v18 = vsel (!%p318_p3), %vm400_vm3, 1.0, %v1896_v1  ;;  %v1823_v49 = vld [vmem:[%s2278_s3 + $0x78] sm:$0xff] (!%p318_p3)   ;;  %v1824_v50 = vld [vmem:[%s2278_s3 + $0x80] sm:$0xff] (!%p318_p3)  }
  0x10   : > { %s2296_s10 = smov (!%p362_p5, %s1882_s10), 1  ;;  %v2009_v22 = vpack.c.bf16 %v1423_v16, %v1422_v15  ;;  %v2022_v24 = vpack.c.bf16 %v1426_v18, %v1425_v17  ;;  %v1825_v51 = vld [vmem:[%s2278_s3 + $0x88] sm:$0xff]   ;;  %v1826_v52 = vld [vmem:[%s2278_s3 + $0x90] sm:$0xff]   ;;  %v1827_v53 = vld [vmem:[%s2278_s3 + $0x98] sm:$0xff]  }
  0x11   : > { %s1551_s18 = sshll.u32 %s2296_s10, 4  ;;  %s369_s21 = scalar_lea.vmem %s2277_s2, %s2296_s10  ;;  %v1828_v54 = vld [vmem:[%s2278_s3 + $0xa0] sm:$0xff]   ;;  %v1829_v55 = vld [vmem:[%s2278_s3 + $0xa8] sm:$0xff]   ;;  %v1830_v56 = vld [vmem:[%s2278_s3 + $0xb0] sm:$0xff]  }
  0x12   : > { %s1999_s24 = scalar_lea.vmem %s2275_s0, %s1551_s18  ;;  %v1428_v8 = vld [vmem:[%s369_s21] ss:$0 sm:$0xff]  ;;  %v1831_v57 = vld [vmem:[%s2278_s3 + $0xb8] sm:$0xff]   ;;  %s372_s25 = scalar_lea.vmem %s2281_s6, %s2296_s10 }
  0x13   : > { %v383_v9 = vld [vmem:[%s1999_s24] sm:$0xff]  ;;  %v384_v10 = vld [vmem:[%s1999_s24 + $0x8] sm:$0xff]  ;;  %s376_s23 = scalar_select %p375_p6, %s1878_s30, 1 }
  0x14   : > { %v413_v11 = vmul.f32 %v1427_v4, %v383_v9  ;;  %v414_v12 = vmul.f32 %v1427_v4, %v384_v10  ;;  %v1487_v6 = vld [vmem:[%s2279_s4] ss:$0 sm:$0xff]  ;;  %s1306_s28 = scalar_lea.vmem %s1999_s24, %s1421_s26  ;;  %s1296_s18 = scalar_lea.vmem [#allocation2], %s1421_s26 }
  0x15   : > { %v1488_v10 = vld [vmem:[%s2280_s5] ss:$0 sm:$0xff] }
  0x16   : > { %v422_v13 = vadd.f32 %v1428_v8, %v413_v11  ;;  %v423_v14 = vadd.f32 %v1428_v8, %v414_v12 }
  0x18   : > { %v424_v19 = vmax.f32 %v422_v13, 0.0  ;;  %v425_v20 = vmax.f32 %v423_v14, 0.0  ;;  %v1489_v14 = vld [vmem:[%s372_s25] ss:$0 sm:$0xff]  ;;  %s1419_s25 = sshll.u32 %s2296_s10, 1 }
  0x19   : > { %s378_s27 = sadd.s32 %s1419_s25, %s376_s23 }
  0x1a   : > { %v2007_v21 = vpack.c.bf16 %v425_v20, %v424_v19  ;;  %s1420_s17 = sshll.u32 %s378_s27, 3 }
  0x1b   : > { %s380_s21 = scalar_lea.vmem %s2284_s9, %s1420_s17 }
  0x1c   : > { %1615 = vmatpush3.bf16.msra.mxu0 %v2007_v21 }
  0x1d   : > { %1620 = vmatprep.subr.bf16.mxu0 %v1896_v1 }
  0x1f   : > { %1617 = vmatmul.mubr.msk.bf16.vlgmr.msra.gmra.mrb[0].mxu0 %vm427_vm5, %v2009_v22 }
  0x20   : > { %1621 = vmatpush3.bf16.msra.mxu0 %v2007_v21  ;;  %1622 = vmatprep.mubr.msk.bf16.mxu0 %vm1897_vm0, %v1896_v1 }
  0x21   : > { %1626 = vmatprep.subr.bf16.mxu0 %v1896_v1 }
  0x27   : > { %1623 = vmatmul.mubr.msk.bf16.vlgmr.msra.gmra.mrb[4].mxu0 %vm427_vm5, %v2022_v24 }
  0x28   : > { %1627 = vmatpush3.bf16.msra.mxu0 %v1808_v23  ;;  %1642 = vmatprep.mubr.msk.bf16.mxu0 %vm1897_vm0, %v1896_v1 }
  0x29   : > { %1628 = vmatprep.subr.bf16.mxu0 %v1896_v1 }
  0x2c   : > { %1629 = vmatpush3.bf16.msra.mxu0 %v1809_v25  ;;  %v1832_v25 = vld [vmem:[%s2282_s7] sm:$0xff]  }
  0x2d   : > { %1630 = vmatprep.subr.bf16.mxu0 %v1896_v1 }
  0x30   : > { %1631 = vmatpush3.bf16.msra.mxu0 %v1810_v26  ;;  %v1833_v26 = vld [vmem:[%s2282_s7 + $0x8] sm:$0xff]  }
  0x31   : > { %1632 = vmatprep.subr.bf16.mxu0 %v1896_v1 }
  0x34   : > { %1633 = vmatpush3.bf16.msra.mxu0 %v1811_v27  ;;  %v1836_v27 = vld [vmem:[%s2282_s7 + $0x20] sm:$0xff]  }
  0x35   : > { %1634 = vmatprep.subr.bf16.mxu0 %v1896_v1 }
  0x38   : > { %1635 = vmatpush3.bf16.msra.mxu0 %v1812_v28  ;;  %v1837_v28 = vld [vmem:[%s2282_s7 + $0x28] sm:$0xff]  }
  0x39   : > { %1636 = vmatprep.subr.bf16.mxu0 %v1896_v1 }
  0x3c   : > { %1637 = vmatpush3.bf16.msra.mxu0 %v1813_v29  ;;  %v1838_v29 = vld [vmem:[%s2282_s7 + $0x30] sm:$0xff]  }
  0x3d   : > { %1638 = vmatprep.subr.bf16.mxu0 %v1896_v1 }
  0x40   : > { %1639 = vmatpush3.bf16.msra.mxu0 %v1814_v30  ;;  %v1839_v30 = vld [vmem:[%s2282_s7 + $0x38] sm:$0xff]  }
  0x41   : > { %1640 = vmatprep.subr.bf16.mxu0 %v1896_v1 }
  0x44   : > { %1641 = vmatpush3.bf16.msra.mxu0 %v1815_v31 }
  0x45   : > { %1646 = vmatprep.subr.bf16.mxu0 %v1896_v1 }
  0xf2   : > { %v465_v32 = vpop.f32.mrb[0].mxu0 }
  0xf3   : > { %v1618_v33 = vpop.f32.mrb[1].mxu0 }
  0xf4   : > { %v468_v34 = vpop.f32.mrb[2].mxu0 }
  0xf5   : > { %v472_v36 = vpack.c.bf16 %v468_v34, %v465_v32  ;;  %v1619_v37 = vpop.f32.mrb[3].mxu0  ;;  %v1840_v34 = vld [vmem:[%s2282_s7 + $0x40] sm:$0xff]  }
  0xf6   : > { %v1841_v37 = vld [vmem:[%s2282_s7 + $0x48] sm:$0xff]  }
  0xf7   : > { %1643 = vmatmul.mubr.bf16.vlgmr.msra.gmra.mrb[8].mxu0 %v472_v36 }
  0xf8   : > { %1647 = vmatpush3.bf16.msra.mxu0 %v1816_v35  ;;  %1662 = vmatprep.mubr.msk.bf16.mxu0 %vm1897_vm0, %v1896_v1 }
  0xf9   : > { %1648 = vmatprep.subr.bf16.mxu0 %v1896_v1 }
  0xfa   : > { %v510_v39 = vpop.f32.mrb[4].mxu0 }
  0xfb   : > { %v1624_v40 = vpop.f32.mrb[5].mxu0 }
  0xfc   : > { %1649 = vmatpush3.bf16.msra.mxu0 %v1817_v38  ;;  %v513_v42 = vpop.f32.mrb[6].mxu0  ;;  %v1842_v40 = vld [vmem:[%s2282_s7 + $0x50] sm:$0xff]  }
  0xfd   : > { %1650 = vmatprep.subr.bf16.mxu0 %v1896_v1  ;;  %v517_v43 = vpack.c.bf16 %v513_v42, %v510_v39  ;;  %v1625_v44 = vpop.f32.mrb[7].mxu0 }
  0xfe   : > { %v1843_v44 = vld [vmem:[%s2282_s7 + $0x58] sm:$0xff]  }
 0x100   : > { %1651 = vmatpush3.bf16.msra.mxu0 %v1818_v41 }
 0x101   : > { %1652 = vmatprep.subr.bf16.mxu0 %v1896_v1 }
 0x104   : > { %1653 = vmatpush3.bf16.msra.mxu0 %v1819_v45  ;;  %v1844_v45 = vld [vmem:[%s2282_s7 + $0x60] sm:$0xff]  }
 0x105   : > { %1654 = vmatprep.subr.bf16.mxu0 %v1896_v1 }
 0x108   : > { %1655 = vmatpush3.bf16.msra.mxu0 %v1820_v46  ;;  %v1845_v46 = vld [vmem:[%s2282_s7 + $0x68] sm:$0xff]  }
 0x109   : > { %1656 = vmatprep.subr.bf16.mxu0 %v1896_v1 }
 0x10c   : > { %1657 = vmatpush3.bf16.msra.mxu0 %v1821_v47  ;;  %v1846_v47 = vld [vmem:[%s2282_s7 + $0x70] sm:$0xff]  }
 0x10d   : > { %1658 = vmatprep.subr.bf16.mxu0 %v1896_v1 }
 0x110   : > { %1659 = vmatpush3.bf16.msra.mxu0 %v1822_v48  ;;  %v1847_v48 = vld [vmem:[%s2282_s7 + $0x78] sm:$0xff]  }
 0x111   : > { %1660 = vmatprep.subr.bf16.mxu0 %v1896_v1 }
 0x114   : > { %1661 = vmatpush3.bf16.msra.mxu0 %v1823_v49  ;;  %v1848_v49 = vld [vmem:[%s2282_s7 + $0x80] sm:$0xff]  }
 0x115   : > { %1666 = vmatprep.subr.bf16.mxu0 %v1896_v1 }
 0x117   : > { %1663 = vmatmul.mubr.bf16.vlgmr.msra.gmra.mrb[12].mxu0 %v2007_v21 }
 0x118   : > { %1667 = vmatpush3.bf16.msra.mxu0 %v1824_v50  ;;  %1682 = vmatprep.mubr.msk.bf16.mxu0 %vm1897_vm0, %v1896_v1  ;;  %v1849_v50 = vld [vmem:[%s2282_s7 + $0x88] sm:$0xff]  }
 0x119   : > { %1668 = vmatprep.subr.bf16.mxu0 %v1896_v1 }
 0x11c   : > { %1669 = vmatpush3.bf16.msra.mxu0 %v1825_v51  ;;  %v1850_v51 = vld [vmem:[%s2282_s7 + $0x90] sm:$0xff]  }
 0x11d   : > { %1670 = vmatprep.subr.bf16.mxu0 %v1896_v1 }
 0x120   : > { %1671 = vmatpush3.bf16.msra.mxu0 %v1826_v52  ;;  %v1851_v52 = vld [vmem:[%s2282_s7 + $0x98] sm:$0xff]  }
 0x121   : > { %1672 = vmatprep.subr.bf16.mxu0 %v1896_v1 }
 0x124   : > { %1673 = vmatpush3.bf16.msra.mxu0 %v1827_v53  ;;  %v1852_v53 = vld [vmem:[%s2282_s7 + $0xa0] sm:$0xff]  }
 0x125   : > { %1674 = vmatprep.subr.bf16.mxu0 %v1896_v1 }
 0x128   : > { %1675 = vmatpush3.bf16.msra.mxu0 %v1828_v54  ;;  %v1853_v54 = vld [vmem:[%s2282_s7 + $0xa8] sm:$0xff]  }
 0x129   : > { %1676 = vmatprep.subr.bf16.mxu0 %v1896_v1 }
 0x12c   : > { %1677 = vmatpush3.bf16.msra.mxu0 %v1829_v55  ;;  %v1854_v55 = vld [vmem:[%s2282_s7 + $0xb0] sm:$0xff]  }
 0x12d   : > { %1678 = vmatprep.subr.bf16.mxu0 %v1896_v1 }
 0x130   : > { %1679 = vmatpush3.bf16.msra.mxu0 %v1830_v56  ;;  %v1855_v56 = vld [vmem:[%s2282_s7 + $0xb8] sm:$0xff]  }
 0x131   : > { %1680 = vmatprep.subr.bf16.mxu0 %v1896_v1 }
 0x134   : > { %1681 = vmatpush3.bf16.msra.mxu0 %v1831_v57 }
 0x137   : > { %1683 = vmatmul.mubr.bf16.vlgmr.msra.gmra.mrb[16].mxu0 %v517_v43 }
 0x1ca   : > { %v616_v58 = vpop.f32.mrb[8].mxu0 }
 0x1cb   : > { %v1644_v59 = vpop.f32.mrb[9].mxu0 }
 0x1cc   : > { %v619_v60 = vpop.f32.mrb[10].mxu0 }
 0x1cd   : > { %v1645_v61 = vpop.f32.mrb[11].mxu0 }
 0x1ce   : > { %v1548_v61 = vld [vmem:[%s2283_s8] ss:$0 sm:$0xff] }
 0x1ea   : > { %v726_v62 = vpop.f32.mrb[12].mxu0 }
 0x1eb   : > { %v733_v63 = vadd.f32 %v726_v62, %v616_v58  ;;  %v1664_v0 = vpop.f32.mrb[13].mxu0 }
 0x1ec   : > { %v729_v2 = vpop.f32.mrb[14].mxu0 }
 0x1ed   : > { %v734_v3 = vadd.f32 %v729_v2, %v619_v60  ;;  %v1665_v4 = vpop.f32.mrb[15].mxu0 }
 0x20a   : > { %v838_v5 = vpop.f32.mrb[16].mxu0 }
 0x20b   : > { %v845_v7 = vadd.f32 %v838_v5, %v733_v63  ;;  %v1684_v8 = vpop.f32.mrb[17].mxu0 }
 0x20c   : > { %v841_v9 = vpop.f32.mrb[18].mxu0 }
 0x20d   : > { %v846_v11 = vadd.f32 %v841_v9, %v734_v3  ;;  %v1685_v12 = vpop.f32.mrb[19].mxu0  ;;  %v858_v13 = vadd.f32 %v1487_v6, %v845_v7 }
 0x20f   : > { %v859_v15 = vadd.f32 %v1487_v6, %v846_v11  ;;  %v867_v16 = vmul.f32 %v1488_v10, %v858_v13 }
 0x211   : > { %v868_v17 = vmul.f32 %v1488_v10, %v859_v15  ;;  %v876_v18 = vadd.f32 %v1489_v14, %v867_v16 }
 0x213   : > { %v877_v19 = vadd.f32 %v1489_v14, %v868_v17  ;;  %v878_v20 = vmax.f32 %v876_v18, 0.0 }
 0x215   : > { %v879_v21 = vmax.f32 %v877_v19, 0.0 }
 0x217   : > { %v2135_v23 = vpack.c.bf16 %v879_v21, %v878_v20 }
 0x219   : > { %1687 = vmatpush3.bf16.msra.mxu1 %v2135_v23 }
 0x21a   : > { %1692 = vmatprep.subr.bf16.mxu1 %v1896_v1 }
 0x21c   : > { %1689 = vmatmul.mubr.msk.bf16.vlgmr.msra.gmra.mrb[0].mxu1 %vm427_vm5, %v2009_v22  ;;  %v1834_v22 = vld [vmem:[%s2282_s7 + $0x10] sm:$0xff]  }
 0x21d   : > { %1693 = vmatpush3.bf16.msra.mxu1 %v2135_v23  ;;  %1694 = vmatprep.mubr.msk.bf16.mxu1 %vm1897_vm0, %v1896_v1 }
 0x21e   : > { %1698 = vmatprep.subr.bf16.mxu1 %v1896_v1 }
 0x224   : > { %1695 = vmatmul.mubr.msk.bf16.vlgmr.msra.gmra.mrb[4].mxu1 %vm427_vm5, %v2022_v24  ;;  %v1835_v24 = vld [vmem:[%s2282_s7 + $0x18] sm:$0xff]  }
 0x225   : > { %1699 = vmatpush3.bf16.msra.mxu1 %v1832_v25  ;;  %1714 = vmatprep.mubr.msk.bf16.mxu1 %vm1897_vm0, %v1896_v1 }
 0x226   : > { %1700 = vmatprep.subr.bf16.mxu1 %v1896_v1 }
 0x229   : > { %1701 = vmatpush3.bf16.msra.mxu1 %v1833_v26 }
 0x22a   : > { %1702 = vmatprep.subr.bf16.mxu1 %v1896_v1 }
 0x22d   : > { %1703 = vmatpush3.bf16.msra.mxu1 %v1834_v22 }
 0x22e   : > { %1704 = vmatprep.subr.bf16.mxu1 %v1896_v1 }
 0x231   : > { %1705 = vmatpush3.bf16.msra.mxu1 %v1835_v24 }
 0x232   : > { %1706 = vmatprep.subr.bf16.mxu1 %v1896_v1 }
 0x235   : > { %1707 = vmatpush3.bf16.msra.mxu1 %v1836_v27 }
 0x236   : > { %1708 = vmatprep.subr.bf16.mxu1 %v1896_v1 }
 0x239   : > { %1709 = vmatpush3.bf16.msra.mxu1 %v1837_v28 }
 0x23a   : > { %1710 = vmatprep.subr.bf16.mxu1 %v1896_v1 }
 0x23d   : > { %1711 = vmatpush3.bf16.msra.mxu1 %v1838_v29 }
 0x23e   : > { %1712 = vmatprep.subr.bf16.mxu1 %v1896_v1 }
 0x241   : > { %1713 = vmatpush3.bf16.msra.mxu1 %v1839_v30 }
 0x242   : > { %1718 = vmatprep.subr.bf16.mxu1 %v1896_v1 }
 0x2ef   : > { %v915_v31 = vpop.f32.mrb[0].mxu1 }
 0x2f0   : > { %v1690_v32 = vpop.f32.mrb[1].mxu1 }
 0x2f1   : > { %v918_v33 = vpop.f32.mrb[2].mxu1 }
 0x2f2   : > { %v922_v35 = vpack.c.bf16 %v918_v33, %v915_v31  ;;  %v1691_v36 = vpop.f32.mrb[3].mxu1 }
 0x2f4   : > { %1715 = vmatmul.mubr.bf16.vlgmr.msra.gmra.mrb[8].mxu1 %v922_v35 }
 0x2f5   : > { %1719 = vmatpush3.bf16.msra.mxu1 %v1840_v34  ;;  %1734 = vmatprep.mubr.msk.bf16.mxu1 %vm1897_vm0, %v1896_v1 }
 0x2f6   : > { %1720 = vmatprep.subr.bf16.mxu1 %v1896_v1 }
 0x2f7   : > { %v957_v38 = vpop.f32.mrb[4].mxu1 }
 0x2f8   : > { %v1696_v39 = vpop.f32.mrb[5].mxu1 }
 0x2f9   : > { %1721 = vmatpush3.bf16.msra.mxu1 %v1841_v37  ;;  %v960_v41 = vpop.f32.mrb[6].mxu1 }
 0x2fa   : > { %1722 = vmatprep.subr.bf16.mxu1 %v1896_v1  ;;  %v964_v42 = vpack.c.bf16 %v960_v41, %v957_v38  ;;  %v1697_v43 = vpop.f32.mrb[7].mxu1 }
 0x2fd   : > { %1723 = vmatpush3.bf16.msra.mxu1 %v1842_v40 }
 0x2fe   : > { %1724 = vmatprep.subr.bf16.mxu1 %v1896_v1 }
 0x301   : > { %1725 = vmatpush3.bf16.msra.mxu1 %v1843_v44 }
 0x302   : > { %1726 = vmatprep.subr.bf16.mxu1 %v1896_v1 }
 0x305   : > { %1727 = vmatpush3.bf16.msra.mxu1 %v1844_v45 }
 0x306   : > { %1728 = vmatprep.subr.bf16.mxu1 %v1896_v1 }
 0x309   : > { %1729 = vmatpush3.bf16.msra.mxu1 %v1845_v46 }
 0x30a   : > { %1730 = vmatprep.subr.bf16.mxu1 %v1896_v1 }
 0x30d   : > { %1731 = vmatpush3.bf16.msra.mxu1 %v1846_v47 }
 0x30e   : > { %1732 = vmatprep.subr.bf16.mxu1 %v1896_v1 }
 0x311   : > { %1733 = vmatpush3.bf16.msra.mxu1 %v1847_v48 }
 0x312   : > { %1738 = vmatprep.subr.bf16.mxu1 %v1896_v1 }
 0x314   : > { %1735 = vmatmul.mubr.bf16.vlgmr.msra.gmra.mrb[8].mxu1 %v2135_v23 }
 0x315   : > { %1739 = vmatpush3.bf16.msra.mxu1 %v1848_v49  ;;  %1754 = vmatprep.mubr.msk.bf16.mxu1 %vm1897_vm0, %v1896_v1 }
 0x316   : > { %1740 = vmatprep.subr.bf16.mxu1 %v1896_v1 }
 0x319   : > { %1741 = vmatpush3.bf16.msra.mxu1 %v1849_v50 }
 0x31a   : > { %1742 = vmatprep.subr.bf16.mxu1 %v1896_v1 }
 0x31d   : > { %1743 = vmatpush3.bf16.msra.mxu1 %v1850_v51 }
 0x31e   : > { %1744 = vmatprep.subr.bf16.mxu1 %v1896_v1 }
 0x321   : > { %1745 = vmatpush3.bf16.msra.mxu1 %v1851_v52 }
 0x322   : > { %1746 = vmatprep.subr.bf16.mxu1 %v1896_v1 }
 0x325   : > { %1747 = vmatpush3.bf16.msra.mxu1 %v1852_v53 }
 0x326   : > { %1748 = vmatprep.subr.bf16.mxu1 %v1896_v1 }
 0x329   : > { %1749 = vmatpush3.bf16.msra.mxu1 %v1853_v54 }
 0x32a   : > { %1750 = vmatprep.subr.bf16.mxu1 %v1896_v1 }
 0x32d   : > { %1751 = vmatpush3.bf16.msra.mxu1 %v1854_v55 }
 0x32e   : > { %1752 = vmatprep.subr.bf16.mxu1 %v1896_v1  ;;  %v1307_v1 = vld [vmem:[%s1306_s28] sm:$0xff] }
 0x331   : > { %1753 = vmatpush3.bf16.msra.mxu1 %v1855_v56 }
 0x334   : > { %1755 = vmatmul.mubr.bf16.vlgmr.msra.gmra.mrb[8].mxu1 %v964_v42 }
 0x407   : > { %v1285_v57 = vpop.f32.mrb[8].mxu1 }
 0x408   : > { %1294 = vst [vmem:[#allocation2] sm:$0xff] %v1285_v57  ;;  %v1756_v58 = vpop.f32.mrb[9].mxu1 }
 0x409   : > { %v1288_v59 = vpop.f32.mrb[10].mxu1 }
 0x40a   : > { %1295 = vst [vmem:[#allocation2 + $0x8] sm:$0xff] %v1288_v59  ;;  %v1757_v60 = vpop.f32.mrb[11].mxu1 }
 0x411   : > { %v1297_v62 = vld [vmem:[%s1296_s18] sm:$0xff] }
 0x412   : > { %v1305_v63 = vadd.f32 %v1548_v61, %v1297_v62 }
 0x414   : > { %v1308_v0 = vadd.f32 %v1307_v1, %v1305_v63 }
 0x416   : > { %1309 = vst [vmem:[%s380_s21] sm:$0xff] %v1308_v0 }
 0x417 PF: > { %s19_s13 = sadd.s32 1, %s1894_s13   ;;  %s2285_s30 = smov %s1886_s11 }
 0x418   : > { %p16_p7 = scmp.ge.s32.totalorder %s19_s13, 6   ;;  %s2286_s10 = smov %s1890_s12 }
 0x419   : > { %s2287_s11 = smov %s2290_s14  ;;  %s2288_s12 = smov %s2294_s15 }
 0x41a   :  { %18 = sbr.rel (!%p16_p7) target bundleno = 3 (0x3), region = 98 }

</bundles_post_ra>
